<compile_context>
chip_gen: v7x
topology: tpu7x:2x2x1
jax: 0.10.0
libtpu: 0.0.40
codegen_flags: <defaults>
</compile_context>

<pallas_src>
import jax
import jax.numpy as jnp
from jax.experimental import pallas as pl
from jax.experimental.pallas import tpu as pltpu

KERNEL_SIZE = 7
PAD = KERNEL_SIZE // 2


def _eca_kernel(x_ref, w_ref, b_ref, o_ref):
    """One batch block.  x_ref/o_ref: (TB, C, HW) VMEM; w_ref:(7,), b_ref:(1,) SMEM."""
    hw = x_ref.shape[-1]
    C = x_ref.shape[1]

    xf = x_ref[...].astype(jnp.float32)                       # (TB, C, HW)

    # --- spatial reductions: per-(batch, channel) mean and max ---
    avg = jnp.sum(xf, axis=-1) * (1.0 / float(hw))             # (TB, C), C on lanes
    mx = jnp.max(xf, axis=-1)                                  # (TB, C)

    # --- fused 7-tap Conv1d over the channel (lane) axis ---
    # conv is linear: conv(avg) + conv(max) == conv(avg + max); the bias is
    # counted twice, exactly like conv(avg) + conv(max) in the PyTorch forward.
    s = avg + mx                                               # (TB, C)
    c_idx = jax.lax.broadcasted_iota(jnp.int32, s.shape, 1)
    acc = jnp.zeros_like(s)
    for k in range(KERNEL_SIZE):
        d = k - PAD                                            # tap offset, -3..3
        shift = (-d) % C
        rolled = pltpu.roll(s, shift=shift, axis=1) if shift else s
        if d == 0:
            term = rolled
        else:
            # roll is circular; mask wrapped lanes to reproduce Conv1d zero padding
            valid = (c_idx + d >= 0) & (c_idx + d < C)
            term = jnp.where(valid, rolled, 0.0)
        acc = acc + w_ref[k] * term
    gate = jax.nn.sigmoid(acc + 2.0 * b_ref[0])                # (TB, C) channel gate

    # --- scale the input block.  Re-read the ref so the big f32 copy used for
    # the reductions need not stay live across the gate computation. ---
    o_ref[...] = (x_ref[...].astype(jnp.float32) * gate[:, :, None]).astype(o_ref.dtype)


def eca_attention(x, conv_w, conv_b, *, target_block_bytes=2 << 20):
    """ECAAttention forward.  x: (B, C, H, W) -> (B, C, H, W), same dtype."""
    B, C, H, W = x.shape
    HW = H * W
    x3 = x.reshape(B, C, HW)                 # metadata-only reshape, no HBM pass

    slab_bytes = C * HW * x3.dtype.itemsize  # one batch element, streamed dtype
    f32_slab = C * HW * 4                    # in-kernel f32 temporaries

    # Batch-block size: ~target-sized tiles; grid uses cdiv (partial last block ok).
    tb = max(1, int(target_block_bytes // slab_bytes))
    tb = min(tb, B)
    # v7x megacore: prefer >= 2 grid steps, but only if tiles stay >= ~1 MiB
    # (on single-TC v5e/v6e the extra step is harmless).
    if B >= 2 and pl.cdiv(B, tb) < 2:
        tb_half = pl.cdiv(B, 2)
        if tb_half * slab_bytes >= (1 << 20):
            tb = tb_half
    grid = (pl.cdiv(B, tb),)

    # Explicit VMEM budget: double-buffered in + out tiles + f32 temporaries.
    tile_in = tb * slab_bytes
    tile_f32 = tb * f32_slab
    vmem_need = 4 * tile_in + 2 * tile_f32 + (1 << 20)
    if vmem_need > (56 << 20):
        # TODO(synk): for huge C*HW slabs, split the spatial axis over a second
        # 'arbitrary' grid axis (sum/max accumulator pass, then a scale pass)
        # instead of failing.
        raise ValueError(
            f"ECA tile of {tile_in / 2**20:.1f} MiB needs ~{vmem_need / 2**20:.1f} "
            "MiB of VMEM which does not fit on-chip; reduce target_block_bytes "
            "or split the spatial axis.")
    vmem_limit = int(min(64 << 20, max(32 << 20, vmem_need)))

    w = conv_w.reshape(KERNEL_SIZE).astype(jnp.float32)
    b = conv_b.reshape(1).astype(jnp.float32)

    out = pl.pallas_call(
        _eca_kernel,
        out_shape=jax.ShapeDtypeStruct((B, C, HW), x3.dtype),
        grid=grid,
        in_specs=[
            pl.BlockSpec((tb, C, HW), lambda i: (i, 0, 0)),
            pl.BlockSpec(memory_space=pltpu.SMEM),
            pl.BlockSpec(memory_space=pltpu.SMEM),
        ],
        out_specs=pl.BlockSpec((tb, C, HW), lambda i: (i, 0, 0)),
        compiler_params=pltpu.CompilerParams(
            dimension_semantics=("parallel",),
            vmem_limit_bytes=vmem_limit),
    )(x3, w, b)

    return out.reshape(B, C, H, W)


def eca_reference(x, conv_w, conv_b):
    """Pure-JAX reference reproducing the PyTorch forward."""
    B, C, H, W = x.shape
    avg = x.mean(axis=(2, 3))                                  # (B, C)
    mx = x.max(axis=(2, 3))                                    # (B, C)

    def conv1d(s):
        sp = jnp.pad(s, ((0, 0), (PAD, PAD)))
        out = jnp.zeros_like(s)
        for k in range(KERNEL_SIZE):
            out = out + conv_w[k] * sp[:, k:k + C]
        return out + conv_b

    y = jax.nn.sigmoid(conv1d(avg) + conv1d(mx))               # (B, C)
    return x * y[:, :, None, None]


if __name__ == "__main__":
    key = jax.random.PRNGKey(0)
    kx1, kx2, kw, kb = jax.random.split(key, 4)

    # Deterministic Conv1d(1, 1, kernel_size=7, padding=3) parameters
    # (PyTorch default init style: U(-1/sqrt(fan_in), 1/sqrt(fan_in)), fan_in=7).
    bound = 7.0 ** -0.5
    conv_w = jax.random.uniform(kw, (KERNEL_SIZE,), jnp.float32, -bound, bound)
    conv_b = jax.random.uniform(kb, (1,), jnp.float32, -bound, bound)

    # Case 1: lane-aligned spatial extent (H*W = 256, multiple of 128).
    x1 = jax.random.normal(kx1, (4, 128, 16, 16), dtype=jnp.float32)
    out1 = jax.block_until_ready(eca_attention(x1, conv_w, conv_b))
    ref1 = eca_reference(x1, conv_w, conv_b)
    assert jnp.allclose(out1, ref1, atol=1e-5, rtol=1e-5), (
        float(jnp.max(jnp.abs(out1 - ref1))))

    # Case 2: non-multiple-of-128 spatial extent (H*W = 36), streamed directly
    # with a full-extent last-dim block -- no wrapper pad / slice HBM passes.
    x2 = jax.random.normal(kx2, (3, 128, 6, 6), dtype=jnp.float32)
    out2 = jax.block_until_ready(eca_attention(x2, conv_w, conv_b))
    ref2 = eca_reference(x2, conv_w, conv_b)
    assert jnp.allclose(out2, ref2, atol=1e-5, rtol=1e-5), (
        float(jnp.max(jnp.abs(out2 - ref2))))

    print("KERNEL_OK")
</pallas_src>

<mosaic_0001>
module attributes {stable_mosaic.version = 11 : i64} {
  func.func @_eca_kernel(%arg0: i32, %arg1: memref<4x128x256xf32, #tpu.memory_space<vmem>>, %arg2: memref<7xf32, #tpu.memory_space<smem>>, %arg3: memref<1xf32, #tpu.memory_space<smem>>, %arg4: memref<4x128x256xf32, #tpu.memory_space<vmem>>) attributes {dimension_semantics = [#tpu.dimension_semantics<parallel>], iteration_bounds = array<i64: 1>, scalar_prefetch = 0 : i64, scratch_operands = 0 : i64, tpu.core_type = #tpu.core_type<tc>, window_params = [{transform_indices = @transform_0, window_bounds = array<i64: 4, 128, 256>}, {transform_indices = @transform_1, window_bounds = array<i64: 7>}, {transform_indices = @transform_2, window_bounds = array<i64: 1>}, {transform_indices = @transform_3, window_bounds = array<i64: 4, 128, 256>}]} {
    %c0 = arith.constant 0 : index
    %c0_0 = arith.constant 0 : index
    %c0_1 = arith.constant 0 : index
    %0 = vector.load %arg1[%c0, %c0_0, %c0_1] : memref<4x128x256xf32, #tpu.memory_space<vmem>>, vector<4x128x256xf32>
    %cst = arith.constant dense<0.000000e+00> : vector<4x128xf32>
    %1 = vector.multi_reduction <add>, %0, %cst [2] : vector<4x128x256xf32> to vector<4x128xf32>
    %cst_2 = arith.constant 3.906250e-03 : f32
    %2 = vector.broadcast %cst_2 : f32 to vector<4x128xf32>
    %3 = arith.mulf %1, %2 : vector<4x128xf32>
    %cst_3 = arith.constant dense<0xFF800000> : vector<4x128xf32>
    %4 = vector.multi_reduction <maximumf>, %0, %cst_3 [2] : vector<4x128x256xf32> to vector<4x128xf32>
    %5 = arith.addf %3, %4 : vector<4x128xf32>
    %6 = tpu.iota {dimensions = array<i32: 1>} : vector<4x128xi32>
    %cst_4 = arith.constant 0.000000e+00 : f32
    %7 = vector.broadcast %cst_4 : f32 to vector<4x128xf32>
    %c3_i32 = arith.constant 3 : i32
    %8 = tpu.dynamic_rotate %5 by %c3_i32 dim 1 : vector<4x128xf32>, i32 -> vector<4x128xf32>
    %c-3_i32 = arith.constant -3 : i32
    %9 = vector.broadcast %c-3_i32 : i32 to vector<4x128xi32>
    %10 = arith.addi %6, %9 : vector<4x128xi32>
    %c0_i32 = arith.constant 0 : i32
    %11 = vector.broadcast %c0_i32 : i32 to vector<4x128xi32>
    %12 = arith.cmpi sge, %10, %11 : vector<4x128xi32>
    %c-3_i32_5 = arith.constant -3 : i32
    %13 = vector.broadcast %c-3_i32_5 : i32 to vector<4x128xi32>
    %14 = arith.addi %6, %13 : vector<4x128xi32>
    %c128_i32 = arith.constant 128 : i32
    %15 = vector.broadcast %c128_i32 : i32 to vector<4x128xi32>
    %16 = arith.cmpi slt, %14, %15 : vector<4x128xi32>
    %17 = arith.andi %12, %16 : vector<4x128xi1>
    %cst_6 = arith.constant 0.000000e+00 : f32
    %18 = vector.broadcast %cst_6 : f32 to vector<4x128xf32>
    %19 = arith.select %17, %8, %18 : vector<4x128xi1>, vector<4x128xf32>
    %c0_7 = arith.constant 0 : index
    %20 = memref.load %arg2[%c0_7] : memref<7xf32, #tpu.memory_space<smem>>
    %21 = vector.broadcast %20 : f32 to vector<4x128xf32>
    %22 = arith.mulf %21, %19 : vector<4x128xf32>
    %23 = arith.addf %7, %22 : vector<4x128xf32>
    %c2_i32 = arith.constant 2 : i32
    %24 = tpu.dynamic_rotate %5 by %c2_i32 dim 1 : vector<4x128xf32>, i32 -> vector<4x128xf32>
    %c-2_i32 = arith.constant -2 : i32
    %25 = vector.broadcast %c-2_i32 : i32 to vector<4x128xi32>
    %26 = arith.addi %6, %25 : vector<4x128xi32>
    %c0_i32_8 = arith.constant 0 : i32
    %27 = vector.broadcast %c0_i32_8 : i32 to vector<4x128xi32>
    %28 = arith.cmpi sge, %26, %27 : vector<4x128xi32>
    %c-2_i32_9 = arith.constant -2 : i32
    %29 = vector.broadcast %c-2_i32_9 : i32 to vector<4x128xi32>
    %30 = arith.addi %6, %29 : vector<4x128xi32>
    %c128_i32_10 = arith.constant 128 : i32
    %31 = vector.broadcast %c128_i32_10 : i32 to vector<4x128xi32>
    %32 = arith.cmpi slt, %30, %31 : vector<4x128xi32>
    %33 = arith.andi %28, %32 : vector<4x128xi1>
    %cst_11 = arith.constant 0.000000e+00 : f32
    %34 = vector.broadcast %cst_11 : f32 to vector<4x128xf32>
    %35 = arith.select %33, %24, %34 : vector<4x128xi1>, vector<4x128xf32>
    %c1 = arith.constant 1 : index
    %36 = memref.load %arg2[%c1] : memref<7xf32, #tpu.memory_space<smem>>
    %37 = vector.broadcast %36 : f32 to vector<4x128xf32>
    %38 = arith.mulf %37, %35 : vector<4x128xf32>
    %39 = arith.addf %23, %38 : vector<4x128xf32>
    %c1_i32 = arith.constant 1 : i32
    %40 = tpu.dynamic_rotate %5 by %c1_i32 dim 1 : vector<4x128xf32>, i32 -> vector<4x128xf32>
    %c-1_i32 = arith.constant -1 : i32
    %41 = vector.broadcast %c-1_i32 : i32 to vector<4x128xi32>
    %42 = arith.addi %6, %41 : vector<4x128xi32>
    %c0_i32_12 = arith.constant 0 : i32
    %43 = vector.broadcast %c0_i32_12 : i32 to vector<4x128xi32>
    %44 = arith.cmpi sge, %42, %43 : vector<4x128xi32>
    %c-1_i32_13 = arith.constant -1 : i32
    %45 = vector.broadcast %c-1_i32_13 : i32 to vector<4x128xi32>
    %46 = arith.addi %6, %45 : vector<4x128xi32>
    %c128_i32_14 = arith.constant 128 : i32
    %47 = vector.broadcast %c128_i32_14 : i32 to vector<4x128xi32>
    %48 = arith.cmpi slt, %46, %47 : vector<4x128xi32>
    %49 = arith.andi %44, %48 : vector<4x128xi1>
    %cst_15 = arith.constant 0.000000e+00 : f32
    %50 = vector.broadcast %cst_15 : f32 to vector<4x128xf32>
    %51 = arith.select %49, %40, %50 : vector<4x128xi1>, vector<4x128xf32>
    %c2 = arith.constant 2 : index
    %52 = memref.load %arg2[%c2] : memref<7xf32, #tpu.memory_space<smem>>
    %53 = vector.broadcast %52 : f32 to vector<4x128xf32>
    %54 = arith.mulf %53, %51 : vector<4x128xf32>
    %55 = arith.addf %39, %54 : vector<4x128xf32>
    %c3 = arith.constant 3 : index
    %56 = memref.load %arg2[%c3] : memref<7xf32, #tpu.memory_space<smem>>
    %57 = vector.broadcast %56 : f32 to vector<4x128xf32>
    %58 = arith.mulf %57, %5 : vector<4x128xf32>
    %59 = arith.addf %55, %58 : vector<4x128xf32>
    %c127_i32 = arith.constant 127 : i32
    %60 = tpu.dynamic_rotate %5 by %c127_i32 dim 1 : vector<4x128xf32>, i32 -> vector<4x128xf32>
    %c1_i32_16 = arith.constant 1 : i32
    %61 = vector.broadcast %c1_i32_16 : i32 to vector<4x128xi32>
    %62 = arith.addi %6, %61 : vector<4x128xi32>
    %c0_i32_17 = arith.constant 0 : i32
    %63 = vector.broadcast %c0_i32_17 : i32 to vector<4x128xi32>
    %64 = arith.cmpi sge, %62, %63 : vector<4x128xi32>
    %c1_i32_18 = arith.constant 1 : i32
    %65 = vector.broadcast %c1_i32_18 : i32 to vector<4x128xi32>
    %66 = arith.addi %6, %65 : vector<4x128xi32>
    %c128_i32_19 = arith.constant 128 : i32
    %67 = vector.broadcast %c128_i32_19 : i32 to vector<4x128xi32>
    %68 = arith.cmpi slt, %66, %67 : vector<4x128xi32>
    %69 = arith.andi %64, %68 : vector<4x128xi1>
    %cst_20 = arith.constant 0.000000e+00 : f32
    %70 = vector.broadcast %cst_20 : f32 to vector<4x128xf32>
    %71 = arith.select %69, %60, %70 : vector<4x128xi1>, vector<4x128xf32>
    %c4 = arith.constant 4 : index
    %72 = memref.load %arg2[%c4] : memref<7xf32, #tpu.memory_space<smem>>
    %73 = vector.broadcast %72 : f32 to vector<4x128xf32>
    %74 = arith.mulf %73, %71 : vector<4x128xf32>
    %75 = arith.addf %59, %74 : vector<4x128xf32>
    %c126_i32 = arith.constant 126 : i32
    %76 = tpu.dynamic_rotate %5 by %c126_i32 dim 1 : vector<4x128xf32>, i32 -> vector<4x128xf32>
    %c2_i32_21 = arith.constant 2 : i32
    %77 = vector.broadcast %c2_i32_21 : i32 to vector<4x128xi32>
    %78 = arith.addi %6, %77 : vector<4x128xi32>
    %c0_i32_22 = arith.constant 0 : i32
    %79 = vector.broadcast %c0_i32_22 : i32 to vector<4x128xi32>
    %80 = arith.cmpi sge, %78, %79 : vector<4x128xi32>
    %c2_i32_23 = arith.constant 2 : i32
    %81 = vector.broadcast %c2_i32_23 : i32 to vector<4x128xi32>
    %82 = arith.addi %6, %81 : vector<4x128xi32>
    %c128_i32_24 = arith.constant 128 : i32
    %83 = vector.broadcast %c128_i32_24 : i32 to vector<4x128xi32>
    %84 = arith.cmpi slt, %82, %83 : vector<4x128xi32>
    %85 = arith.andi %80, %84 : vector<4x128xi1>
    %cst_25 = arith.constant 0.000000e+00 : f32
    %86 = vector.broadcast %cst_25 : f32 to vector<4x128xf32>
    %87 = arith.select %85, %76, %86 : vector<4x128xi1>, vector<4x128xf32>
    %c5 = arith.constant 5 : index
    %88 = memref.load %arg2[%c5] : memref<7xf32, #tpu.memory_space<smem>>
    %89 = vector.broadcast %88 : f32 to vector<4x128xf32>
    %90 = arith.mulf %89, %87 : vector<4x128xf32>
    %91 = arith.addf %75, %90 : vector<4x128xf32>
    %c125_i32 = arith.constant 125 : i32
    %92 = tpu.dynamic_rotate %5 by %c125_i32 dim 1 : vector<4x128xf32>, i32 -> vector<4x128xf32>
    %c3_i32_26 = arith.constant 3 : i32
    %93 = vector.broadcast %c3_i32_26 : i32 to vector<4x128xi32>
    %94 = arith.addi %6, %93 : vector<4x128xi32>
    %c0_i32_27 = arith.constant 0 : i32
    %95 = vector.broadcast %c0_i32_27 : i32 to vector<4x128xi32>
    %96 = arith.cmpi sge, %94, %95 : vector<4x128xi32>
    %c3_i32_28 = arith.constant 3 : i32
    %97 = vector.broadcast %c3_i32_28 : i32 to vector<4x128xi32>
    %98 = arith.addi %6, %97 : vector<4x128xi32>
    %c128_i32_29 = arith.constant 128 : i32
    %99 = vector.broadcast %c128_i32_29 : i32 to vector<4x128xi32>
    %100 = arith.cmpi slt, %98, %99 : vector<4x128xi32>
    %101 = arith.andi %96, %100 : vector<4x128xi1>
    %cst_30 = arith.constant 0.000000e+00 : f32
    %102 = vector.broadcast %cst_30 : f32 to vector<4x128xf32>
    %103 = arith.select %101, %92, %102 : vector<4x128xi1>, vector<4x128xf32>
    %c6 = arith.constant 6 : index
    %104 = memref.load %arg2[%c6] : memref<7xf32, #tpu.memory_space<smem>>
    %105 = vector.broadcast %104 : f32 to vector<4x128xf32>
    %106 = arith.mulf %105, %103 : vector<4x128xf32>
    %107 = arith.addf %91, %106 : vector<4x128xf32>
    %c0_31 = arith.constant 0 : index
    %108 = memref.load %arg3[%c0_31] : memref<1xf32, #tpu.memory_space<smem>>
    %cst_32 = arith.constant 2.000000e+00 : f32
    %109 = arith.mulf %cst_32, %108 : f32
    %110 = vector.broadcast %109 : f32 to vector<4x128xf32>
    %111 = arith.addf %107, %110 : vector<4x128xf32>
    %112 = arith.negf %111 : vector<4x128xf32>
    %113 = math.exp %112 : vector<4x128xf32>
    %cst_33 = arith.constant 1.000000e+00 : f32
    %114 = vector.broadcast %cst_33 : f32 to vector<4x128xf32>
    %115 = arith.addf %114, %113 : vector<4x128xf32>
    %116 = arith.divf %114, %115 : vector<4x128xf32>
    %c0_34 = arith.constant 0 : index
    %c0_35 = arith.constant 0 : index
    %c0_36 = arith.constant 0 : index
    %117 = vector.load %arg1[%c0_34, %c0_35, %c0_36] : memref<4x128x256xf32, #tpu.memory_space<vmem>>, vector<4x128x256xf32>
    %118 = vector.shape_cast %116 : vector<4x128xf32> to vector<4x128x1xf32>
    %119 = vector.broadcast %118 : vector<4x128x1xf32> to vector<4x128x256xf32>
    %120 = arith.mulf %117, %119 : vector<4x128x256xf32>
    %c0_37 = arith.constant 0 : index
    %c0_38 = arith.constant 0 : index
    %c0_39 = arith.constant 0 : index
    %121 = vector.load %arg4[%c0_37, %c0_38, %c0_39] : memref<4x128x256xf32, #tpu.memory_space<vmem>>, vector<4x128x256xf32>
    tpu.vector_store %arg4[%c0_37, %c0_38, %c0_39], %120 {strides = array<i32>} : memref<4x128x256xf32, #tpu.memory_space<vmem>>, vector<4x128x256xf32>,
    return
  }
  func.func @transform_0(%arg0: i32) -> (i32, i32, i32) {
    %c0_i32 = arith.constant 0 : i32
    %c0_i32_0 = arith.constant 0 : i32
    %c0_i32_1 = arith.constant 0 : i32
    return %arg0, %c0_i32, %c0_i32_0 : i32, i32, i32
  }
  func.func @transform_1(%arg0: i32) -> i32 {
    %c0_i32 = arith.constant 0 : i32
    %c0_i32_0 = arith.constant 0 : i32
    return %c0_i32 : i32
  }
  func.func @transform_2(%arg0: i32) -> i32 {
    %c0_i32 = arith.constant 0 : i32
    %c0_i32_0 = arith.constant 0 : i32
    return %c0_i32 : i32
  }
  func.func @transform_3(%arg0: i32) -> (i32, i32, i32) {
    %c0_i32 = arith.constant 0 : i32
    %c0_i32_0 = arith.constant 0 : i32
    %c0_i32_1 = arith.constant 0 : i32
    return %arg0, %c0_i32, %c0_i32_0 : i32, i32, i32
  }
}

</mosaic_0001>

<bundles_post_ra>
// kernel: tpu_custom_call.1
= control target key start
LH: loop header
LB: loop body
LE: loop exit
PB: predicated region body
PF: predicated region fallthrough
CT: control target
= control target key end

     0   :  { %9 = vsyncpa [#allocation4], 0  ;;  %s3723_s0 = inlined_call_operand.hbm [shape: f32[4,128,256], index: 0, kind: input, shape index: {}]   ;;  %s3724_s1 = inlined_call_operand.vmem [shape: f32[7], index: 1, kind: input, shape index: {}]   ;;  %s3725_s2 = inlined_call_operand.<no memory space> [shape: f32[1], index: 2, kind: input, shape index: {}]   ;;  %s3726_s3 = inlined_call_operand.hbm [shape: f32[4,128,256], index: 3, kind: output, shape index: {}]  }
   0x1   :  { %10 = vsyncpa [#allocation6], 0 }
   0x2   :  { %11 = vsyncpa [#allocation5], 0  ;;  %s2383_s12 = smov [#allocation3]   ;;  %s30_s16 = sshll.u32 %s3724_s1, 4  ;;  %s31_s16 = int_to_ptr.vmem [resolvable:$true] %s30_s16 }
   0x3   :  { %s17_s13 = sshll.u32 %s2383_s12, 4  ;;  %s2321_s19 = scalar_lea.hbm %s3723_s0, 16384  ;;  %s18_s13 = int_to_ptr.vmem [resolvable:$true] %s17_s13 }
   0x4   :  { %p2322_p0 = scmp.ne.s32.totalorder %s3723_s0, %s2321_s19  ;;  %p2325_p1 = scmp.lt.u32.totalorder %s2321_s19, %s3723_s0 }
   0x6   :  { %p2327_p2 = pnand %p2325_p1, %p2322_p0 }
   0x8   :  { %2330 = shalt.err (!%p2327_p2)
}
   0x9   :  { %s2331_s24 = scalar_lea.vmem %s18_s13, 16384  ;;  %p2336_p4 = scmp.lt.s32.totalorder %s18_s13, %s18_s13 }
   0xa   :  { %p2332_p3 = scmp.ne.s32.totalorder %s18_s13, %s2331_s24  ;;  %p2337_p5 = scmp.lt.s32.totalorder %s2331_s24, %s2331_s24 }
   0xc   :  { %p2338_p6 = por %p2337_p5, %p2336_p4 }
   0xe   :  { %p2339_p7 = pnand %p2338_p6, %p2332_p3 }
  0x10   :  { %2342 = shalt.err (!%p2339_p7)
}
  0x11   :  { %s2384_s1 = smov 256   ;;  %s2385_s25 = smov 16  }
  0x12   :  { %23 = dma.hbm_to_vmem [thread:$0]  %s3723_s0, 16384, %s18_s13, [#allocation4], %s2384_s1, %s2384_s1, %s2385_s25  }
  0x13   :  { %s2343_s28 = scalar_lea.vmem %s31_s16, 16  ;;  %p2348_p9 = scmp.lt.s32.totalorder %s31_s16, %s31_s16 }
  0x14   :  { %p2344_p8 = scmp.ne.s32.totalorder %s31_s16, %s2343_s28  ;;  %p2349_p10 = scmp.lt.s32.totalorder %s2343_s28, %s2343_s28 }
  0x16   :  { %p2350_p11 = por %p2349_p10, %p2348_p9 }
  0x18   :  { %p2351_p12 = pnand %p2350_p11, %p2344_p8 }
  0x1a   :  { %2354 = shalt.err (!%p2351_p12)
}
  0x1b   :  { %s2386_s29 = smov [#allocation7]  }
  0x1c   :  { %33 = dma.vmem_to_smem %s31_s16, 16, %s2386_s29, [#allocation6]  }
  0x1d   :  { %2377 = dma.done.wait [#allocation4], 16384  }
  0x1e   :  { %2378 = vsyncadd [#allocation4], 4294950912 }
  0x1f   :  { %2379 = dma.done.wait [#allocation6], 16  }
  0x20   :  { %2380 = vsyncadd [#allocation6], 4294967280 }
  0x21   :  { %42 = sfence }
  0x22   :  { %v2432_v0 = vld [vmem:[#allocation3 + $0x20] sm:$0xff]  ;;  %v2434_v1 = vld [vmem:[#allocation3 + $0x28] sm:$0xff]  ;;  %v2442_v5 = vld [vmem:[#allocation3 + $0x30] sm:$0xff]  ;;  %s2173_s0 = sld [smem:[#allocation7 + $0x3]]  ;;  %vm758_vm0 = vcmask 130112   ;;  %vm765_vm1 = vcmask 195712  }
  0x23   :  { %v2436_v2 = vld [vmem:[#allocation3] sm:$0xff]  ;;  %v177_v3 = vadd.f32 %v2434_v1, %v2432_v0  ;;  %v2440_v4 = vld [vmem:[#allocation3 + $0x8] sm:$0xff]  ;;  %v2444_v6 = vld [vmem:[#allocation3 + $0x38] sm:$0xff]  ;;  %vm772_vm2 = vcmask 261312   ;;  %vm779_vm3 = vcmask 326912   ;;  %vm786_vm4 = vcmask 392512  }
  0x24   :  { %v171_v7 = vadd.f32 %v2440_v4, %v2436_v2  ;;  %v2448_v8 = vld [vmem:[#allocation3 + $0x10] sm:$0xff]  ;;  %v2450_v9 = vld [vmem:[#allocation3 + $0x18] sm:$0xff]  ;;  %v180_v10 = vadd.f32 %v2444_v6, %v2442_v5  ;;  %v2460_v14 = vld [vmem:[#allocation3 + $0x40] sm:$0xff]  ;;  %vm793_vm5 = vcmask 458112   ;;  %vm800_vm6 = vcmask 523712   ;;  %s2387_s30 = smov 2  }
  0x25   :  { %178 = vadd.xlane.f32.xlu1 %v177_v3  ;;  %v174_v11 = vadd.f32 %v2450_v9, %v2448_v8  ;;  %v2456_v12 = vld [vmem:[#allocation3 + $0x50] sm:$0xff]  ;;  %v2458_v13 = vld [vmem:[#allocation3 + $0x58] sm:$0xff]  ;;  %v2462_v15 = vld [vmem:[#allocation3 + $0x48] sm:$0xff]  ;;  %vm807_vm7 = vcmask 589312   ;;  %vm814_vm8 = vcmask 654912   ;;  %vm821_vm9 = vcmask 720512  }
  0x26   :  { %172 = vadd.xlane.f32.xlu0 %v171_v7  ;;  %v186_v16 = vadd.f32 %v2458_v13, %v2456_v12  ;;  %v183_v17 = vadd.f32 %v2462_v15, %v2460_v14  ;;  %v2468_v18 = vld [vmem:[#allocation3 + $0x70] sm:$0xff]  ;;  %v2470_v19 = vld [vmem:[#allocation3 + $0x78] sm:$0xff]  ;;  %v2472_v20 = vld [vmem:[#allocation3 + $0x60] sm:$0xff]  ;;  %vm828_vm10 = vcmask 786112   ;;  %vm835_vm11 = vcmask 851712   ;;  %s2388_s4 = smov 3  }
  0x27   :  { %v2474_v21 = vld [vmem:[#allocation3 + $0x68] sm:$0xff]  ;;  %v192_v22 = vadd.f32 %v2470_v19, %v2468_v18  ;;  %v2480_v24 = vld [vmem:[#allocation3 + $0x90] sm:$0xff]  ;;  %v2482_v25 = vld [vmem:[#allocation3 + $0x98] sm:$0xff]  ;;  %vm842_vm12 = vcmask 917312   ;;  %vm849_vm13 = vcmask 982912   ;;  %vm856_vm14 = vcmask 1048512  }
  0x28   :  { %v189_v23 = vadd.f32 %v2474_v21, %v2472_v20  ;;  %v2484_v26 = vld [vmem:[#allocation3 + $0x80] sm:$0xff]  ;;  %v2486_v27 = vld [vmem:[#allocation3 + $0x88] sm:$0xff]  ;;  %v198_v28 = vadd.f32 %v2482_v25, %v2480_v24  ;;  %v2492_v30 = vld [vmem:[#allocation3 + $0xb0] sm:$0xff]  ;;  %vm1095_vm15 = vcmask 1041409   ;;  %s2389_s5 = smov 1   ;;  %s2390_s6 = smov 126  }
  0x29   :  { %181 = vadd.xlane.f32.xlu1 %v180_v10  ;;  %v195_v29 = vadd.f32 %v2486_v27, %v2484_v26  ;;  %3807 = vst [vmem:[#allocation12_spill] sm:$0xff] %v2492_v30  ;;  %v2494_v31 = vld [vmem:[#allocation3 + $0xb8] sm:$0xff]  ;;  %v2496_v32 = vld [vmem:[#allocation3 + $0xa0] sm:$0xff]  ;;  %v2498_v33 = vld [vmem:[#allocation3 + $0xa8] sm:$0xff]  ;;  %s2391_s7 = smov 127   ;;  %s2392_s8 = smov 125  }
  0x2a   :  { %175 = vadd.xlane.f32.xlu0 %v174_v11  ;;  %3808 = vst [vmem:[#allocation13_spill] sm:$0xff] %v2494_v31  ;;  %3809 = vst [vmem:[#allocation14_spill] sm:$0xff] %v2496_v32  ;;  %v204_v34 = vadd.f32 %v2494_v31, %v2492_v30  ;;  %v201_v35 = vadd.f32 %v2498_v33, %v2496_v32  ;;  %v2504_v36 = vld [vmem:[#allocation3 + $0xd0] sm:$0xff]  ;;  %v2506_v37 = vld [vmem:[#allocation3 + $0xd8] sm:$0xff]  ;;  %s2171_s9 = sld [smem:[#allocation7 + $0x1]]  ;;  %s1109_s10 = sld [smem:[#allocation7]] }
  0x2b   :  { %3810 = vst [vmem:[#allocation15_spill] sm:$0xff] %v2498_v33  ;;  %3811 = vst [vmem:[#allocation16_spill] sm:$0xff] %v2504_v36  ;;  %v2508_v38 = vld [vmem:[#allocation3 + $0xc0] sm:$0xff]  ;;  %v2510_v39 = vld [vmem:[#allocation3 + $0xc8] sm:$0xff]  ;;  %v210_v40 = vadd.f32 %v2506_v37, %v2504_v36  ;;  %s2172_s11 = sld [smem:[#allocation7 + $0x2]]  ;;  %s2174_s12 = sld [smem:[#allocation7 + $0x4]] }
  0x2c   :  { %3812 = vst [vmem:[#allocation17_spill] sm:$0xff] %v2506_v37  ;;  %3813 = vst [vmem:[#allocation18_spill] sm:$0xff] %v2508_v38  ;;  %v207_v41 = vadd.f32 %v2510_v39, %v2508_v38  ;;  %v2516_v42 = vld [vmem:[#allocation3 + $0xf0] sm:$0xff]  ;;  %v2518_v43 = vld [vmem:[#allocation3 + $0xf8] sm:$0xff]  ;;  %s2175_s13 = sld [smem:[#allocation7 + $0x5]]  ;;  %s2176_s14 = sld [smem:[#allocation7 + $0x6]] }
  0x2d   :  { %187 = vadd.xlane.f32.xlu1 %v186_v16  ;;  %3814 = vst [vmem:[#allocation19_spill] sm:$0xff] %v2510_v39  ;;  %3815 = vst [vmem:[#allocation20_spill] sm:$0xff] %v2516_v42  ;;  %v2520_v44 = vld [vmem:[#allocation3 + $0xe0] sm:$0xff]  ;;  %v2522_v45 = vld [vmem:[#allocation3 + $0xe8] sm:$0xff]  ;;  %v216_v46 = vadd.f32 %v2518_v43, %v2516_v42  ;;  %s1620_s17 = smul.f32 2.0, %s3725_s2  ;;  %s2393_s2 = smov [#allocation8]  }
  0x2e   :  { %184 = vadd.xlane.f32.xlu0 %v183_v17  ;;  %3816 = vst [vmem:[#allocation21_spill] sm:$0xff] %v2518_v43  ;;  %3817 = vst [vmem:[#allocation22_spill] sm:$0xff] %v2520_v44  ;;  %v213_v47 = vadd.f32 %v2522_v45, %v2520_v44  ;;  %v2528_v48 = vld [vmem:[#allocation3 + $0x110] sm:$0xff]  ;;  %v2530_v49 = vld [vmem:[#allocation3 + $0x118] sm:$0xff]  ;;  %s2158_s18 = sshll.u32 %s2393_s2, 4  ;;  %s2159_s18 = int_to_ptr.vmem [resolvable:$true] %s2158_s18 }
  0x2f   :  { %3818 = vst [vmem:[#allocation23_spill] sm:$0xff] %v2522_v45  ;;  %v2532_v50 = vld [vmem:[#allocation3 + $0x100] sm:$0xff]  ;;  %v2534_v51 = vld [vmem:[#allocation3 + $0x108] sm:$0xff]  ;;  %v222_v52 = vadd.f32 %v2530_v49, %v2528_v48  ;;  %v2540_v54 = vld [vmem:[#allocation3 + $0x130] sm:$0xff]  ;;  %s2355_s19 = scalar_lea.vmem %s2159_s18, 16384  ;;  %p2360_p0 = scmp.lt.s32.totalorder %s2159_s18, %s2159_s18 }
  0x30   :  { %v219_v53 = vadd.f32 %v2534_v51, %v2532_v50  ;;  %v2542_v55 = vld [vmem:[#allocation3 + $0x138] sm:$0xff]  ;;  %v2544_v56 = vld [vmem:[#allocation3 + $0x120] sm:$0xff]  ;;  %v2546_v57 = vld [vmem:[#allocation3 + $0x128] sm:$0xff]  ;;  %p2356_p13 = scmp.ne.s32.totalorder %s2159_s18, %s2355_s19  ;;  %p2361_p1 = scmp.lt.s32.totalorder %s2355_s19, %s2355_s19 }
  0x31   :  { %193 = vadd.xlane.f32.xlu1 %v192_v22  ;;  %v228_v58 = vadd.f32 %v2542_v55, %v2540_v54  ;;  %v225_v59 = vadd.f32 %v2546_v57, %v2544_v56  ;;  %v2552_v60 = vld [vmem:[#allocation3 + $0x150] sm:$0xff]  ;;  %v2554_v61 = vld [vmem:[#allocation3 + $0x158] sm:$0xff]  ;;  %v2556_v62 = vld [vmem:[#allocation3 + $0x140] sm:$0xff] }
  0x32   :  { %190 = vadd.xlane.f32.xlu0 %v189_v23  ;;  %v2558_v63 = vld [vmem:[#allocation3 + $0x148] sm:$0xff]  ;;  %v234_v3 = vadd.f32 %v2554_v61, %v2552_v60  ;;  %v2564_v10 = vld [vmem:[#allocation3 + $0x170] sm:$0xff]  ;;  %v2566_v11 = vld [vmem:[#allocation3 + $0x178] sm:$0xff]  ;;  %p2362_p2 = por %p2361_p1, %p2360_p0 }
  0x33   :  { %v231_v7 = vadd.f32 %v2558_v63, %v2556_v62  ;;  %3819 = vst [vmem:[#allocation24_spill] sm:$0xff] %v2564_v10  ;;  %3820 = vst [vmem:[#allocation25_spill] sm:$0xff] %v2566_v11  ;;  %v2568_v16 = vld [vmem:[#allocation3 + $0x160] sm:$0xff]  ;;  %v2570_v17 = vld [vmem:[#allocation3 + $0x168] sm:$0xff]  ;;  %v240_v22 = vadd.f32 %v2566_v11, %v2564_v10 }
  0x34   :  { %v237_v23 = vadd.f32 %v2570_v17, %v2568_v16  ;;  %v2614_v43 = vld [vmem:[#allocation3 + $0x1f8] sm:$0xff]  ;;  %v2616_v44 = vld [vmem:[#allocation3 + $0x1e0] sm:$0xff]  ;;  %v2618_v45 = vld [vmem:[#allocation3 + $0x1e8] sm:$0xff]  ;;  %p2363_p3 = pnand %p2362_p2, %p2356_p13 }
  0x35   :  { %199 = vadd.xlane.f32.xlu1 %v198_v28  ;;  %v2576_v28 = vld [vmem:[#allocation3 + $0x190] sm:$0xff]  ;;  %3834 = vst [vmem:[#allocation39_spill] sm:$0xff] %v2614_v43  ;;  %3835 = vst [vmem:[#allocation40_spill] sm:$0xff] %v2616_v44  ;;  %v2630_v37 = vld [vmem:[#allocation3 + $0x208] sm:$0xff] }
  0x36   :  { %196 = vadd.xlane.f32.xlu0 %v195_v29  ;;  %3821 = vst [vmem:[#allocation26_spill] sm:$0xff] %v2576_v28  ;;  %v2578_v29 = vld [vmem:[#allocation3 + $0x198] sm:$0xff]  ;;  %3836 = vst [vmem:[#allocation41_spill] sm:$0xff] %v2618_v45  ;;  %v2652_v38 = vld [vmem:[#allocation3 + $0x240] sm:$0xff] }
  0x37   :  { %3822 = vst [vmem:[#allocation27_spill] sm:$0xff] %v2578_v29  ;;  %v2654_v39 = vld [vmem:[#allocation3 + $0x248] sm:$0xff]  ;;  %v2664_v30 = vld [vmem:[#allocation3 + $0x260] sm:$0xff] }
  0x38   :  { %3841 = vst [vmem:[#allocation46_spill] sm:$0xff] %v2664_v30  ;;  %v2666_v31 = vld [vmem:[#allocation3 + $0x268] sm:$0xff]  ;;  %v2676_v32 = vld [vmem:[#allocation3 + $0x280] sm:$0xff] }
  0x39   :  { %205 = vadd.xlane.f32.xlu1 %v204_v34  ;;  %v2580_v34 = vld [vmem:[#allocation3 + $0x180] sm:$0xff]  ;;  %3842 = vst [vmem:[#allocation47_spill] sm:$0xff] %v2666_v31  ;;  %3845 = vst [vmem:[#allocation50_spill] sm:$0xff] %v2676_v32  ;;  %v2678_v33 = vld [vmem:[#allocation3 + $0x288] sm:$0xff] }
  0x3a   :  { %202 = vadd.xlane.f32.xlu0 %v201_v35  ;;  %3823 = vst [vmem:[#allocation28_spill] sm:$0xff] %v2580_v34  ;;  %v2582_v35 = vld [vmem:[#allocation3 + $0x188] sm:$0xff]  ;;  %3846 = vst [vmem:[#allocation51_spill] sm:$0xff] %v2678_v33  ;;  %v2748_v10 = vld [vmem:[#allocation3 + $0x340] sm:$0xff] }
  0x3b   :  { %3824 = vst [vmem:[#allocation29_spill] sm:$0xff] %v2582_v35  ;;  %3862 = vst [vmem:[#allocation67_spill] sm:$0xff] %v2748_v10  ;;  %v2750_v11 = vld [vmem:[#allocation3 + $0x348] sm:$0xff] }
  0x3c   :  { %3863 = vst [vmem:[#allocation68_spill] sm:$0xff] %v2750_v11 }
  0x3d   :  { %211 = vadd.xlane.f32.xlu1 %v210_v40  ;;  %v246_v40 = vadd.f32 %v2578_v29, %v2576_v28  ;;  %v2686_v29 = vld [vmem:[#allocation3 + $0x2b8] sm:$0xff] }
  0x3e   :  { %208 = vadd.xlane.f32.xlu0 %v207_v41  ;;  %v243_v41 = vadd.f32 %v2582_v35, %v2580_v34  ;;  %3848 = vst [vmem:[#allocation53_spill] sm:$0xff] %v2686_v29  ;;  %v2746_v35 = vld [vmem:[#allocation3 + $0x358] sm:$0xff] }
  0x3f   :  { %3861 = vst [vmem:[#allocation66_spill] sm:$0xff] %v2746_v35 }
  0x41   :  { %217 = vadd.xlane.f32.xlu1 %v216_v46  ;;  %v2588_v46 = vld [vmem:[#allocation3 + $0x1b0] sm:$0xff] }
  0x42   :  { %214 = vadd.xlane.f32.xlu0 %v213_v47  ;;  %3825 = vst [vmem:[#allocation30_spill] sm:$0xff] %v2588_v46  ;;  %v2590_v47 = vld [vmem:[#allocation3 + $0x1b8] sm:$0xff] }
  0x43   :  { %3826 = vst [vmem:[#allocation31_spill] sm:$0xff] %v2590_v47 }
  0x45   :  { %223 = vadd.xlane.f32.xlu1 %v222_v52  ;;  %v2592_v52 = vld [vmem:[#allocation3 + $0x1a0] sm:$0xff] }
  0x46   :  { %220 = vadd.xlane.f32.xlu0 %v219_v53  ;;  %3827 = vst [vmem:[#allocation32_spill] sm:$0xff] %v2592_v52  ;;  %v2594_v53 = vld [vmem:[#allocation3 + $0x1a8] sm:$0xff] }
  0x47   :  { %3828 = vst [vmem:[#allocation33_spill] sm:$0xff] %v2594_v53 }
  0x49   :  { %229 = vadd.xlane.f32.xlu1 %v228_v58  ;;  %v252_v58 = vadd.f32 %v2590_v47, %v2588_v46  ;;  %v2662_v47 = vld [vmem:[#allocation3 + $0x278] sm:$0xff] }
  0x4a   :  { %226 = vadd.xlane.f32.xlu0 %v225_v59  ;;  %v249_v59 = vadd.f32 %v2594_v53, %v2592_v52  ;;  %3840 = vst [vmem:[#allocation45_spill] sm:$0xff] %v2662_v47  ;;  %v2674_v53 = vld [vmem:[#allocation3 + $0x298] sm:$0xff] }
  0x4b   :  { %3844 = vst [vmem:[#allocation49_spill] sm:$0xff] %v2674_v53 }
  0x4d   :  { %235 = vadd.xlane.f32.xlu1 %v234_v3  ;;  %v2600_v3 = vld [vmem:[#allocation3 + $0x1d0] sm:$0xff] }
  0x4e   :  { %232 = vadd.xlane.f32.xlu0 %v231_v7  ;;  %3829 = vst [vmem:[#allocation34_spill] sm:$0xff] %v2600_v3  ;;  %v2602_v7 = vld [vmem:[#allocation3 + $0x1d8] sm:$0xff] }
  0x4f   :  { %3830 = vst [vmem:[#allocation35_spill] sm:$0xff] %v2602_v7  ;;  %v258_v42 = vadd.f32 %v2602_v7, %v2600_v3  ;;  %v2626_v3 = vld [vmem:[#allocation3 + $0x218] sm:$0xff]  ;;  %v2628_v7 = vld [vmem:[#allocation3 + $0x200] sm:$0xff] }
  0x51   :  { %241 = vadd.xlane.f32.xlu1 %v240_v22  ;;  %v2604_v22 = vld [vmem:[#allocation3 + $0x1c0] sm:$0xff] }
  0x52   :  { %238 = vadd.xlane.f32.xlu0 %v237_v23  ;;  %3831 = vst [vmem:[#allocation36_spill] sm:$0xff] %v2604_v22  ;;  %v2606_v23 = vld [vmem:[#allocation3 + $0x1c8] sm:$0xff] }
  0x53   :  { %3832 = vst [vmem:[#allocation37_spill] sm:$0xff] %v2606_v23 }
  0x55   :  { %247 = vadd.xlane.f32.xlu1 %v246_v40  ;;  %v255_v40 = vadd.f32 %v2606_v23, %v2604_v22  ;;  %v2650_v23 = vld [vmem:[#allocation3 + $0x258] sm:$0xff] }
  0x56   :  { %244 = vadd.xlane.f32.xlu0 %v243_v41  ;;  %v2612_v41 = vld [vmem:[#allocation3 + $0x1f0] sm:$0xff]  ;;  %3838 = vst [vmem:[#allocation43_spill] sm:$0xff] %v2650_v23 }
  0x57   :  { %3833 = vst [vmem:[#allocation38_spill] sm:$0xff] %v2612_v41  ;;  %v264_v36 = vadd.f32 %v2614_v43, %v2612_v41  ;;  %v2638_v41 = vld [vmem:[#allocation3 + $0x238] sm:$0xff]  ;;  %v2640_v43 = vld [vmem:[#allocation3 + $0x220] sm:$0xff] }
  0x59   :  { %253 = vadd.xlane.f32.xlu1 %v252_v58  ;;  %v261_v58 = vadd.f32 %v2618_v45, %v2616_v44  ;;  %v2642_v44 = vld [vmem:[#allocation3 + $0x228] sm:$0xff] }
  0x5a   :  { %250 = vadd.xlane.f32.xlu0 %v249_v59  ;;  %v2624_v59 = vld [vmem:[#allocation3 + $0x210] sm:$0xff] }
  0x5b   :  { %v270_v22 = vadd.f32 %v2626_v3, %v2624_v59 }
  0x5d   :  { %259 = vadd.xlane.f32.xlu1 %v258_v42  ;;  %v267_v42 = vadd.f32 %v2630_v37, %v2628_v7 }
  0x5e   :  { %256 = vadd.xlane.f32.xlu0 %v255_v40  ;;  %v2636_v40 = vld [vmem:[#allocation3 + $0x230] sm:$0xff] }
  0x5f   :  { %v276_v45 = vadd.f32 %v2638_v41, %v2636_v40 }
  0x61   :  { %265 = vadd.xlane.f32.xlu1 %v264_v36  ;;  %v273_v36 = vadd.f32 %v2642_v44, %v2640_v43 }
  0x62   :  { %262 = vadd.xlane.f32.xlu0 %v261_v58  ;;  %v2648_v58 = vld [vmem:[#allocation3 + $0x250] sm:$0xff] }
  0x63   :  { %3837 = vst [vmem:[#allocation42_spill] sm:$0xff] %v2648_v58  ;;  %v282_v46 = vadd.f32 %v2650_v23, %v2648_v58  ;;  %v2760_v58 = vld [vmem:[#allocation3 + $0x360] sm:$0xff]  ;;  %v2762_v23 = vld [vmem:[#allocation3 + $0x368] sm:$0xff] }
  0x64   :  { %3866 = vst [vmem:[#allocation71_spill] sm:$0xff] %v2760_v58  ;;  %3867 = vst [vmem:[#allocation72_spill] sm:$0xff] %v2762_v23 }
  0x65   :  { %271 = vadd.xlane.f32.xlu1 %v270_v22  ;;  %v279_v22 = vadd.f32 %v2654_v39, %v2652_v38 }
  0x66   :  { %268 = vadd.xlane.f32.xlu0 %v267_v42  ;;  %v2660_v42 = vld [vmem:[#allocation3 + $0x270] sm:$0xff] }
  0x67   :  { %3839 = vst [vmem:[#allocation44_spill] sm:$0xff] %v2660_v42  ;;  %v288_v52 = vadd.f32 %v2662_v47, %v2660_v42  ;;  %v2688_v42 = vld [vmem:[#allocation3 + $0x2a0] sm:$0xff]  ;;  %v2690_v47 = vld [vmem:[#allocation3 + $0x2a8] sm:$0xff] }
  0x68   :  { %3849 = vst [vmem:[#allocation54_spill] sm:$0xff] %v2688_v42  ;;  %3850 = vst [vmem:[#allocation55_spill] sm:$0xff] %v2690_v47 }
  0x69   :  { %277 = vadd.xlane.f32.xlu1 %v276_v45  ;;  %v285_v45 = vadd.f32 %v2666_v31, %v2664_v30  ;;  %v2758_v31 = vld [vmem:[#allocation3 + $0x378] sm:$0xff] }
  0x6a   :  { %274 = vadd.xlane.f32.xlu0 %v273_v36  ;;  %v2672_v36 = vld [vmem:[#allocation3 + $0x290] sm:$0xff]  ;;  %3865 = vst [vmem:[#allocation70_spill] sm:$0xff] %v2758_v31 }
  0x6b   :  { %3843 = vst [vmem:[#allocation48_spill] sm:$0xff] %v2672_v36  ;;  %v294_v28 = vadd.f32 %v2674_v53, %v2672_v36  ;;  %v2698_v36 = vld [vmem:[#allocation3 + $0x2d8] sm:$0xff]  ;;  %v2700_v53 = vld [vmem:[#allocation3 + $0x2c0] sm:$0xff] }
  0x6c   :  { %3852 = vst [vmem:[#allocation57_spill] sm:$0xff] %v2698_v36  ;;  %3853 = vst [vmem:[#allocation58_spill] sm:$0xff] %v2700_v53 }
  0x6d   :  { %283 = vadd.xlane.f32.xlu1 %v282_v46  ;;  %v291_v46 = vadd.f32 %v2678_v33, %v2676_v32  ;;  %v2702_v32 = vld [vmem:[#allocation3 + $0x2c8] sm:$0xff] }
  0x6e   :  { %280 = vadd.xlane.f32.xlu0 %v279_v22  ;;  %v2684_v22 = vld [vmem:[#allocation3 + $0x2b0] sm:$0xff]  ;;  %3854 = vst [vmem:[#allocation59_spill] sm:$0xff] %v2702_v32 }
  0x6f   :  { %3847 = vst [vmem:[#allocation52_spill] sm:$0xff] %v2684_v22  ;;  %v300_v34 = vadd.f32 %v2686_v29, %v2684_v22  ;;  %v2710_v22 = vld [vmem:[#allocation3 + $0x2f8] sm:$0xff]  ;;  %v2712_v29 = vld [vmem:[#allocation3 + $0x2e0] sm:$0xff] }
  0x70   :  { %3856 = vst [vmem:[#allocation61_spill] sm:$0xff] %v2710_v22  ;;  %3857 = vst [vmem:[#allocation62_spill] sm:$0xff] %v2712_v29 }
  0x71   :  { %289 = vadd.xlane.f32.xlu1 %v288_v52  ;;  %v297_v52 = vadd.f32 %v2690_v47, %v2688_v42  ;;  %v2714_v42 = vld [vmem:[#allocation3 + $0x2e8] sm:$0xff] }
  0x72   :  { %286 = vadd.xlane.f32.xlu0 %v285_v45  ;;  %v2696_v45 = vld [vmem:[#allocation3 + $0x2d0] sm:$0xff]  ;;  %3858 = vst [vmem:[#allocation63_spill] sm:$0xff] %v2714_v42 }
  0x73   :  { %3851 = vst [vmem:[#allocation56_spill] sm:$0xff] %v2696_v45  ;;  %v306_v33 = vadd.f32 %v2698_v36, %v2696_v45  ;;  %v2722_v45 = vld [vmem:[#allocation3 + $0x318] sm:$0xff]  ;;  %v2724_v36 = vld [vmem:[#allocation3 + $0x300] sm:$0xff] }
  0x75   :  { %295 = vadd.xlane.f32.xlu1 %v294_v28  ;;  %v303_v28 = vadd.f32 %v2702_v32, %v2700_v53  ;;  %v2726_v53 = vld [vmem:[#allocation3 + $0x308] sm:$0xff] }
  0x76   :  { %292 = vadd.xlane.f32.xlu0 %v291_v46  ;;  %v2708_v46 = vld [vmem:[#allocation3 + $0x2f0] sm:$0xff] }
  0x77   :  { %3855 = vst [vmem:[#allocation60_spill] sm:$0xff] %v2708_v46  ;;  %v312_v47 = vadd.f32 %v2710_v22, %v2708_v46  ;;  %v2734_v46 = vld [vmem:[#allocation3 + $0x338] sm:$0xff]  ;;  %v2736_v22 = vld [vmem:[#allocation3 + $0x320] sm:$0xff] }
  0x79   :  { %301 = vadd.xlane.f32.xlu1 %v300_v34  ;;  %v309_v34 = vadd.f32 %v2714_v42, %v2712_v29  ;;  %v2738_v29 = vld [vmem:[#allocation3 + $0x328] sm:$0xff] }
  0x7a   :  { %298 = vadd.xlane.f32.xlu0 %v297_v52  ;;  %v2720_v52 = vld [vmem:[#allocation3 + $0x310] sm:$0xff] }
  0x7b   :  { %v318_v32 = vadd.f32 %v2722_v45, %v2720_v52 }
  0x7d   :  { %307 = vadd.xlane.f32.xlu1 %v306_v33  ;;  %v315_v33 = vadd.f32 %v2726_v53, %v2724_v36 }
  0x7e   :  { %304 = vadd.xlane.f32.xlu0 %v303_v28  ;;  %v2732_v28 = vld [vmem:[#allocation3 + $0x330] sm:$0xff] }
  0x7f   :  { %3859 = vst [vmem:[#allocation64_spill] sm:$0xff] %v2732_v28  ;;  %v324_v42 = vadd.f32 %v2734_v46, %v2732_v28 }
  0x81   :  { %313 = vadd.xlane.f32.xlu1 %v312_v47  ;;  %v321_v47 = vadd.f32 %v2738_v29, %v2736_v22 }
  0x82   :  { %310 = vadd.xlane.f32.xlu0 %v309_v34  ;;  %v2744_v34 = vld [vmem:[#allocation3 + $0x350] sm:$0xff] }
  0x83   :  { %3860 = vst [vmem:[#allocation65_spill] sm:$0xff] %v2744_v34  ;;  %v330_v30 = vadd.f32 %v2746_v35, %v2744_v34  ;;  %v2770_v34 = vld [vmem:[#allocation3 + $0x398] sm:$0xff]  ;;  %v2772_v35 = vld [vmem:[#allocation3 + $0x380] sm:$0xff] }
  0x84   :  { %3869 = vst [vmem:[#allocation74_spill] sm:$0xff] %v2770_v34  ;;  %3870 = vst [vmem:[#allocation75_spill] sm:$0xff] %v2772_v35 }
  0x85   :  { %319 = vadd.xlane.f32.xlu1 %v318_v32  ;;  %v327_v32 = vadd.f32 %v2750_v11, %v2748_v10  ;;  %v2774_v10 = vld [vmem:[#allocation3 + $0x388] sm:$0xff] }
  0x86   :  { %316 = vadd.xlane.f32.xlu0 %v315_v33  ;;  %v2756_v33 = vld [vmem:[#allocation3 + $0x370] sm:$0xff]  ;;  %3871 = vst [vmem:[#allocation76_spill] sm:$0xff] %v2774_v10 }
  0x87   :  { %3864 = vst [vmem:[#allocation69_spill] sm:$0xff] %v2756_v33  ;;  %v336_v28 = vadd.f32 %v2758_v31, %v2756_v33  ;;  %v2782_v33 = vld [vmem:[#allocation3 + $0x3b8] sm:$0xff]  ;;  %v2784_v31 = vld [vmem:[#allocation3 + $0x3a0] sm:$0xff] }
  0x88   :  { %3873 = vst [vmem:[#allocation78_spill] sm:$0xff] %v2782_v33  ;;  %3874 = vst [vmem:[#allocation79_spill] sm:$0xff] %v2784_v31 }
  0x89   :  { %325 = vadd.xlane.f32.xlu1 %v324_v42  ;;  %v333_v42 = vadd.f32 %v2762_v23, %v2760_v58  ;;  %v2786_v58 = vld [vmem:[#allocation3 + $0x3a8] sm:$0xff] }
  0x8a   :  { %322 = vadd.xlane.f32.xlu0 %v321_v47  ;;  %v2768_v47 = vld [vmem:[#allocation3 + $0x390] sm:$0xff]  ;;  %3875 = vst [vmem:[#allocation80_spill] sm:$0xff] %v2786_v58 }
  0x8b   :  { %3868 = vst [vmem:[#allocation73_spill] sm:$0xff] %v2768_v47  ;;  %v342_v11 = vadd.f32 %v2770_v34, %v2768_v47  ;;  %v2794_v47 = vld [vmem:[#allocation3 + $0x3d8] sm:$0xff]  ;;  %v2796_v34 = vld [vmem:[#allocation3 + $0x3c0] sm:$0xff] }
  0x8c   :  { %3877 = vst [vmem:[#allocation82_spill] sm:$0xff] %v2794_v47 }
  0x8d   :  { %331 = vadd.xlane.f32.xlu1 %v330_v30  ;;  %v339_v30 = vadd.f32 %v2774_v10, %v2772_v35  ;;  %v2798_v35 = vld [vmem:[#allocation3 + $0x3c8] sm:$0xff] }
  0x8e   :  { %328 = vadd.xlane.f32.xlu0 %v327_v32  ;;  %v2780_v32 = vld [vmem:[#allocation3 + $0x3b0] sm:$0xff] }
  0x8f   :  { %3872 = vst [vmem:[#allocation77_spill] sm:$0xff] %v2780_v32  ;;  %v348_v23 = vadd.f32 %v2782_v33, %v2780_v32  ;;  %v2806_v32 = vld [vmem:[#allocation3 + $0x3f8] sm:$0xff]  ;;  %v2808_v33 = vld [vmem:[#allocation3 + $0x3e0] sm:$0xff] }
  0x91   :  { %337 = vadd.xlane.f32.xlu1 %v336_v28  ;;  %v345_v28 = vadd.f32 %v2786_v58, %v2784_v31  ;;  %v2810_v31 = vld [vmem:[#allocation3 + $0x3e8] sm:$0xff] }
  0x92   :  { %334 = vadd.xlane.f32.xlu0 %v333_v42  ;;  %v2792_v42 = vld [vmem:[#allocation3 + $0x3d0] sm:$0xff] }
  0x93   :  { %3876 = vst [vmem:[#allocation81_spill] sm:$0xff] %v2792_v42  ;;  %v354_v10 = vadd.f32 %v2794_v47, %v2792_v42  ;;  %v427_v42 = vmax.f32 %v2436_v2, %v2440_v4  ;;  %v436_v47 = vmax.f32 %v2442_v5, %v2444_v6  ;;  %v448_v2 = vmax.f32 %v2468_v18, %v2470_v19 }
  0x94   :  { %v445_v4 = vmax.f32 %v2472_v20, %v2474_v21  ;;  %v451_v5 = vmax.f32 %v2484_v26, %v2486_v27  ;;  %v481_v19 = vmax.f32 %v2544_v56, %v2546_v57  ;;  %v484_v21 = vmax.f32 %v2540_v54, %v2542_v55 }
  0x95   :  { %343 = vadd.xlane.f32.xlu1 %v342_v11  ;;  %v351_v11 = vadd.f32 %v2798_v35, %v2796_v34  ;;  %v571_v27 = vmax.f32 %v2724_v36, %v2726_v53  ;;  %v574_v54 = vmax.f32 %v2720_v52, %v2722_v45  ;;  %v577_v56 = vmax.f32 %v2736_v22, %v2738_v29  ;;  %v3884_v36 = vld [vmem:[#allocation42_spill] sm:$0xff] }
  0x96   :  { %340 = vadd.xlane.f32.xlu0 %v339_v30  ;;  %v2804_v30 = vld [vmem:[#allocation3 + $0x3f0] sm:$0xff]  ;;  %v490_v53 = vmax.f32 %v2552_v60, %v2554_v61  ;;  %v493_v29 = vmax.f32 %v2568_v16, %v2570_v17  ;;  %v3883_v61 = vld [vmem:[#allocation43_spill] sm:$0xff] }
  0x97   :  { %v360_v58 = vadd.f32 %v2806_v32, %v2804_v30  ;;  %v538_v22 = vmax.f32 %v3884_v36, %v3883_v61  ;;  %v3885_v16 = vld [vmem:[#allocation47_spill] sm:$0xff]  ;;  %v3886_v17 = vld [vmem:[#allocation46_spill] sm:$0xff] }
  0x98   :  { %v541_v52 = vmax.f32 %v3886_v17, %v3885_v16  ;;  %v3907_v36 = vld [vmem:[#allocation70_spill] sm:$0xff] }
  0x99   :  { %349 = vadd.xlane.f32.xlu1 %v348_v23  ;;  %v357_v23 = vadd.f32 %v2810_v31, %v2808_v33 }
  0x9a   :  { %346 = vadd.xlane.f32.xlu0 %v345_v28  ;;  %v430_v28 = vmax.f32 %v2448_v8, %v2450_v9  ;;  %v439_v8 = vmax.f32 %v2460_v14, %v2462_v15  ;;  %v478_v9 = vmax.f32 %v2528_v48, %v2530_v49  ;;  %v523_v15 = vmax.f32 %v2628_v7, %v2630_v37 }
  0x9b   :  { %v529_v48 = vmax.f32 %v2640_v43, %v2642_v44  ;;  %v532_v44 = vmax.f32 %v2636_v40, %v2638_v41  ;;  %v3880_v41 = vld [vmem:[#allocation64_spill] sm:$0xff] }
  0x9d   :  { %355 = vadd.xlane.f32.xlu1 %v354_v10  ;;  %v433_v10 = vmax.f32 %v2432_v0, %v2434_v1  ;;  %v454_v0 = vmax.f32 %v2480_v24, %v2482_v25  ;;  %v526_v25 = vmax.f32 %v2624_v59, %v2626_v3  ;;  %v580_v59 = vmax.f32 %v3880_v41, %v2734_v46 }
  0x9e   :  { %352 = vadd.xlane.f32.xlu0 %v351_v11  ;;  %v442_v11 = vmax.f32 %v2456_v12, %v2458_v13  ;;  %v475_v13 = vmax.f32 %v2532_v50, %v2534_v51  ;;  %v487_v50 = vmax.f32 %v2556_v62, %v2558_v63  ;;  %v535_v62 = vmax.f32 %v2652_v38, %v2654_v39  ;;  %v3881_v38 = vld [vmem:[#allocation68_spill] sm:$0xff]  ;;  %v3882_v39 = vld [vmem:[#allocation67_spill] sm:$0xff] }
  0xa1   :  { %361 = vadd.xlane.f32.xlu1 %v360_v58  ;;  %v583_v58 = vmax.f32 %v3882_v39, %v3881_v38  ;;  %v3904_v38 = vld [vmem:[#allocation15_spill] sm:$0xff]  ;;  %v3905_v39 = vld [vmem:[#allocation14_spill] sm:$0xff] }
  0xa2   :  { %358 = vadd.xlane.f32.xlu0 %v357_v23 }
  0xa5   :  { %431 = vmax.xlane.f32.xlu1 %v430_v28 }
  0xa6   :  { %428 = vmax.xlane.f32.xlu0 %v427_v42  ;;  %v3888_v42 = vld [vmem:[#allocation24_spill] sm:$0xff] }
  0xa9   :  { %437 = vmax.xlane.f32.xlu1 %v436_v47  ;;  %v3887_v47 = vld [vmem:[#allocation25_spill] sm:$0xff] }
  0xaa   :  { %434 = vmax.xlane.f32.xlu0 %v433_v10  ;;  %v496_v23 = vmax.f32 %v3888_v42, %v3887_v47  ;;  %v3889_v10 = vld [vmem:[#allocation29_spill] sm:$0xff]  ;;  %v3911_v47 = vld [vmem:[#allocation48_spill] sm:$0xff] }
  0xad   :  { %443 = vmax.xlane.f32.xlu1 %v442_v11  ;;  %v3890_v11 = vld [vmem:[#allocation28_spill] sm:$0xff] }
  0xae   :  { %440 = vmax.xlane.f32.xlu0 %v439_v8  ;;  %v499_v8 = vmax.f32 %v3890_v11, %v3889_v10  ;;  %v3913_v10 = vld [vmem:[#allocation33_spill] sm:$0xff]  ;;  %v3914_v11 = vld [vmem:[#allocation32_spill] sm:$0xff] }
  0xb1   :  { %449 = vmax.xlane.f32.xlu1 %v448_v2 }
  0xb2   :  { %446 = vmax.xlane.f32.xlu0 %v445_v4  ;;  %v2834_v1 = vpop.xlane.xlu1 %178  ;;  %v3891_v4 = vld [vmem:[#allocation66_spill] sm:$0xff] }
  0xb3   :  { %v2838_v6 = vpop.xlane.xlu0 %172 }
  0xb5   :  { %455 = vmax.xlane.f32.xlu1 %v454_v0  ;;  %v3892_v0 = vld [vmem:[#allocation65_spill] sm:$0xff] }
  0xb6   :  { %452 = vmax.xlane.f32.xlu0 %v451_v5  ;;  %v2842_v12 = vpop.xlane.xlu1 %181  ;;  %v586_v5 = vmax.f32 %v3892_v0, %v3891_v4  ;;  %v3916_v0 = vld [vmem:[#allocation13_spill] sm:$0xff] }
  0xb7   :  { %v2846_v14 = vpop.xlane.xlu0 %175 }
  0xb9   :  { %479 = vmax.xlane.f32.xlu1 %v478_v9 }
  0xba   :  { %476 = vmax.xlane.f32.xlu0 %v475_v13  ;;  %v2850_v18 = vpop.xlane.xlu1 %187  ;;  %v3893_v13 = vld [vmem:[#allocation72_spill] sm:$0xff] }
  0xbb   :  { %v2854_v20 = vpop.xlane.xlu0 %184 }
  0xbd   :  { %524 = vmax.xlane.f32.xlu1 %v523_v15  ;;  %v3894_v15 = vld [vmem:[#allocation71_spill] sm:$0xff] }
  0xbe   :  { %482 = vmax.xlane.f32.xlu0 %v481_v19  ;;  %v2858_v24 = vpop.xlane.xlu1 %193  ;;  %v589_v19 = vmax.f32 %v3894_v15, %v3893_v13 }
  0xbf   :  { %v2862_v26 = vpop.xlane.xlu0 %190 }
  0xc1   :  { %485 = vmax.xlane.f32.xlu1 %v484_v21 }
  0xc2   :  { %527 = vmax.xlane.f32.xlu0 %v526_v25  ;;  %v2866_v37 = vpop.xlane.xlu1 %199  ;;  %v3896_v25 = vld [vmem:[#allocation45_spill] sm:$0xff] }
  0xc3   :  { %v2870_v49 = vpop.xlane.xlu0 %196 }
  0xc5   :  { %572 = vmax.xlane.f32.xlu1 %v571_v27  ;;  %v3897_v27 = vld [vmem:[#allocation44_spill] sm:$0xff] }
  0xc6   :  { %530 = vmax.xlane.f32.xlu0 %v529_v48  ;;  %v2874_v51 = vpop.xlane.xlu1 %205  ;;  %v544_v48 = vmax.f32 %v3897_v27, %v3896_v25  ;;  %v3919_v25 = vld [vmem:[#allocation75_spill] sm:$0xff] }
  0xc7   :  { %v2878_v55 = vpop.xlane.xlu0 %202 }
  0xc9   :  { %488 = vmax.xlane.f32.xlu1 %v487_v50 }
  0xca   :  { %575 = vmax.xlane.f32.xlu0 %v574_v54  ;;  %v2882_v43 = vpop.xlane.xlu1 %211  ;;  %v3898_v54 = vld [vmem:[#allocation51_spill] sm:$0xff] }
  0xcb   :  { %v2886_v57 = vpop.xlane.xlu0 %208 }
  0xcd   :  { %578 = vmax.xlane.f32.xlu1 %v577_v56  ;;  %v3899_v56 = vld [vmem:[#allocation50_spill] sm:$0xff] }
  0xce   :  { %533 = vmax.xlane.f32.xlu0 %v532_v44  ;;  %v2890_v63 = vpop.xlane.xlu1 %217  ;;  %v547_v44 = vmax.f32 %v3899_v56, %v3898_v54  ;;  %v3920_v54 = vld [vmem:[#allocation55_spill] sm:$0xff]  ;;  %v3921_v56 = vld [vmem:[#allocation54_spill] sm:$0xff] }
  0xcf   :  { %3878 = vst [vmem:[#allocation83_spill] sm:$0xff] %v2890_v63  ;;  %v2894_v3 = vpop.xlane.xlu0 %214 }
  0xd0   :  { %3879 = vst [vmem:[#allocation84_spill] sm:$0xff] %v2894_v3 }
  0xd1   :  { %536 = vmax.xlane.f32.xlu1 %v535_v62 }
  0xd2   :  { %491 = vmax.xlane.f32.xlu0 %v490_v53  ;;  %v2898_v7 = vpop.xlane.xlu1 %223  ;;  %v3901_v53 = vld [vmem:[#allocation27_spill] sm:$0xff] }
  0xd3   :  { %v2902_v40 = vpop.xlane.xlu0 %220 }
  0xd5   :  { %494 = vmax.xlane.f32.xlu1 %v493_v29  ;;  %v3902_v29 = vld [vmem:[#allocation26_spill] sm:$0xff] }
  0xd6   :  { %581 = vmax.xlane.f32.xlu0 %v580_v59  ;;  %v2906_v60 = vpop.xlane.xlu1 %229  ;;  %v502_v41 = vmax.f32 %v3902_v29, %v3901_v53  ;;  %v3922_v29 = vld [vmem:[#allocation31_spill] sm:$0xff] }
  0xd7   :  { %v2910_v45 = vpop.xlane.xlu0 %226 }
  0xd9   :  { %584 = vmax.xlane.f32.xlu1 %v583_v58  ;;  %v457_v58 = vmax.f32 %v3905_v39, %v3904_v38 }
  0xda   :  { %539 = vmax.xlane.f32.xlu0 %v538_v22  ;;  %v2914_v46 = vpop.xlane.xlu1 %235  ;;  %v3908_v22 = vld [vmem:[#allocation69_spill] sm:$0xff] }
  0xdb   :  { %v2918_v28 = vpop.xlane.xlu0 %232  ;;  %v592_v16 = vmax.f32 %v3908_v22, %v3907_v36  ;;  %v3925_v36 = vld [vmem:[#allocation18_spill] sm:$0xff] }
  0xdd   :  { %542 = vmax.xlane.f32.xlu1 %v541_v52  ;;  %v3910_v52 = vld [vmem:[#allocation49_spill] sm:$0xff] }
  0xde   :  { %497 = vmax.xlane.f32.xlu0 %v496_v23  ;;  %v2922_v2 = vpop.xlane.xlu1 %241  ;;  %v550_v42 = vmax.f32 %v3911_v47, %v3910_v52  ;;  %v3926_v52 = vld [vmem:[#allocation74_spill] sm:$0xff]  ;;  %v3927_v47 = vld [vmem:[#allocation73_spill] sm:$0xff] }
  0xdf   :  { %v2926_v9 = vpop.xlane.xlu0 %238 }
  0xe1   :  { %500 = vmax.xlane.f32.xlu1 %v499_v8  ;;  %v505_v8 = vmax.f32 %v3914_v11, %v3913_v10  ;;  %v3928_v11 = vld [vmem:[#allocation53_spill] sm:$0xff] }
  0xe2   :  { %587 = vmax.xlane.f32.xlu0 %v586_v5  ;;  %v2930_v21 = vpop.xlane.xlu1 %247  ;;  %v3917_v5 = vld [vmem:[#allocation12_spill] sm:$0xff] }
  0xe3   :  { %3895 = vst [vmem:[#allocation64_spill] sm:$0xff] %v2930_v21  ;;  %v2934_v50 = vpop.xlane.xlu0 %244  ;;  %v460_v13 = vmax.f32 %v3917_v5, %v3916_v0 }
  0xe5   :  { %590 = vmax.xlane.f32.xlu1 %v589_v19  ;;  %v3918_v19 = vld [vmem:[#allocation76_spill] sm:$0xff] }
  0xe6   :  { %545 = vmax.xlane.f32.xlu0 %v544_v48  ;;  %v2938_v62 = vpop.xlane.xlu1 %253  ;;  %v595_v27 = vmax.f32 %v3919_v25, %v3918_v19  ;;  %v3931_v19 = vld [vmem:[#allocation36_spill] sm:$0xff] }
  0xe7   :  { %3900 = vst [vmem:[#allocation68_spill] sm:$0xff] %v2938_v62  ;;  %v2942_v59 = vpop.xlane.xlu0 %250 }
  0xe8   :  { %3903 = vst [vmem:[#allocation67_spill] sm:$0xff] %v2942_v59 }
  0xe9   :  { %548 = vmax.xlane.f32.xlu1 %v547_v44  ;;  %v553_v44 = vmax.f32 %v3921_v56, %v3920_v54  ;;  %v3932_v54 = vld [vmem:[#allocation17_spill] sm:$0xff]  ;;  %v3933_v56 = vld [vmem:[#allocation16_spill] sm:$0xff] }
  0xea   :  { %503 = vmax.xlane.f32.xlu0 %v502_v41  ;;  %v2946_v61 = vpop.xlane.xlu1 %259  ;;  %v3923_v41 = vld [vmem:[#allocation30_spill] sm:$0xff] }
  0xeb   :  { %3906 = vst [vmem:[#allocation43_spill] sm:$0xff] %v2946_v61  ;;  %v2950_v17 = vpop.xlane.xlu0 %256  ;;  %v508_v38 = vmax.f32 %v3923_v41, %v3922_v29  ;;  %v3935_v41 = vld [vmem:[#allocation80_spill] sm:$0xff] }
  0xec   :  { %3909 = vst [vmem:[#allocation42_spill] sm:$0xff] %v2950_v17 }
  0xed   :  { %458 = vmax.xlane.f32.xlu1 %v457_v58  ;;  %v3924_v58 = vld [vmem:[#allocation19_spill] sm:$0xff] }
  0xee   :  { %593 = vmax.xlane.f32.xlu0 %v592_v16  ;;  %v2954_v23 = vpop.xlane.xlu1 %265  ;;  %v463_v22 = vmax.f32 %v3925_v36, %v3924_v58 }
  0xef   :  { %3912 = vst [vmem:[#allocation47_spill] sm:$0xff] %v2954_v23  ;;  %v2958_v4 = vpop.xlane.xlu0 %262 }
  0xf0   :  { %3915 = vst [vmem:[#allocation46_spill] sm:$0xff] %v2958_v4  ;;  %v367_v4 = vmul.f32 0.00390625, %v2854_v20  ;;  %v370_v20 = vmul.f32 0.00390625, %v2858_v24 }
  0xf1   :  { %551 = vmax.xlane.f32.xlu1 %v550_v42  ;;  %v598_v42 = vmax.f32 %v3927_v47, %v3926_v52  ;;  %v3939_v52 = vld [vmem:[#allocation58_spill] sm:$0xff] }
  0xf2   :  { %506 = vmax.xlane.f32.xlu0 %v505_v8  ;;  %v2962_v15 = vpop.xlane.xlu1 %271  ;;  %v3929_v8 = vld [vmem:[#allocation52_spill] sm:$0xff] }
  0xf3   :  { %v2966_v48 = vpop.xlane.xlu0 %268  ;;  %v556_v0 = vmax.f32 %v3929_v8, %v3928_v11  ;;  %v3941_v11 = vld [vmem:[#allocation35_spill] sm:$0xff]  ;;  %v3942_v8 = vld [vmem:[#allocation34_spill] sm:$0xff] }
  0xf5   :  { %461 = vmax.xlane.f32.xlu1 %v460_v13  ;;  %v3930_v13 = vld [vmem:[#allocation37_spill] sm:$0xff] }
  0xf6   :  { %596 = vmax.xlane.f32.xlu0 %v595_v27  ;;  %v2970_v53 = vpop.xlane.xlu1 %277  ;;  %v511_v25 = vmax.f32 %v3931_v19, %v3930_v13  ;;  %v3944_v19 = vld [vmem:[#allocation23_spill] sm:$0xff] }
  0xf7   :  { %v2974_v39 = vpop.xlane.xlu0 %274 }
  0xf9   :  { %554 = vmax.xlane.f32.xlu1 %v553_v44  ;;  %v466_v44 = vmax.f32 %v3933_v56, %v3932_v54 }
  0xfa   :  { %509 = vmax.xlane.f32.xlu0 %v508_v38  ;;  %v2978_v16 = vpop.xlane.xlu1 %283  ;;  %v3936_v38 = vld [vmem:[#allocation79_spill] sm:$0xff] }
  0xfb   :  { %v2982_v10 = vpop.xlane.xlu0 %280  ;;  %v601_v58 = vmax.f32 %v3936_v38, %v3935_v41  ;;  %v3947_v41 = vld [vmem:[#allocation78_spill] sm:$0xff] }
  0xfd   :  { %464 = vmax.xlane.f32.xlu1 %v463_v22  ;;  %v3938_v22 = vld [vmem:[#allocation59_spill] sm:$0xff] }
  0xfe   :  { %599 = vmax.xlane.f32.xlu0 %v598_v42  ;;  %v2986_v5 = vpop.xlane.xlu1 %289  ;;  %v559_v47 = vmax.f32 %v3939_v52, %v3938_v22  ;;  %v3951_v22 = vld [vmem:[#allocation56_spill] sm:$0xff] }
  0xff   :  { %v2990_v27 = vpop.xlane.xlu0 %286 }
 0x101   :  { %557 = vmax.xlane.f32.xlu1 %v556_v0  ;;  %v514_v0 = vmax.f32 %v3942_v8, %v3941_v11  ;;  %v3953_v8 = vld [vmem:[#allocation41_spill] sm:$0xff] }
 0x102   :  { %512 = vmax.xlane.f32.xlu0 %v511_v25  ;;  %v2994_v29 = vpop.xlane.xlu1 %295  ;;  %v3945_v25 = vld [vmem:[#allocation22_spill] sm:$0xff] }
 0x103   :  { %3934 = vst [vmem:[#allocation25_spill] sm:$0xff] %v2994_v29  ;;  %v2998_v36 = vpop.xlane.xlu0 %292  ;;  %v469_v54 = vmax.f32 %v3945_v25, %v3944_v19  ;;  %v3957_v19 = vld [vmem:[#allocation20_spill] sm:$0xff] }
 0x104   :  { %3937 = vst [vmem:[#allocation24_spill] sm:$0xff] %v2998_v36 }
 0x105   :  { %467 = vmax.xlane.f32.xlu1 %v466_v44  ;;  %v3948_v44 = vld [vmem:[#allocation77_spill] sm:$0xff] }
 0x106   :  { %602 = vmax.xlane.f32.xlu0 %v601_v58  ;;  %v3002_v42 = vpop.xlane.xlu1 %301  ;;  %v604_v38 = vmax.f32 %v3948_v44, %v3947_v41  ;;  %v3950_v58 = vld [vmem:[#allocation57_spill] sm:$0xff] }
 0x107   :  { %3940 = vst [vmem:[#allocation29_spill] sm:$0xff] %v3002_v42  ;;  %v3006_v13 = vpop.xlane.xlu0 %298  ;;  %v562_v52 = vmax.f32 %v3951_v22, %v3950_v58  ;;  %v3959_v58 = vld [vmem:[#allocation62_spill] sm:$0xff] }
 0x108   :  { %3943 = vst [vmem:[#allocation28_spill] sm:$0xff] %v3006_v13 }
 0x109   :  { %560 = vmax.xlane.f32.xlu1 %v559_v47  ;;  %v3954_v47 = vld [vmem:[#allocation40_spill] sm:$0xff] }
 0x10a   :  { %515 = vmax.xlane.f32.xlu0 %v514_v0  ;;  %v3010_v56 = vpop.xlane.xlu1 %307  ;;  %v517_v13 = vmax.f32 %v3954_v47, %v3953_v8  ;;  %v3956_v0 = vld [vmem:[#allocation21_spill] sm:$0xff]  ;;  %v3960_v47 = vld [vmem:[#allocation39_spill] sm:$0xff] }
 0x10b   :  { %3946 = vst [vmem:[#allocation66_spill] sm:$0xff] %v3010_v56  ;;  %v3014_v29 = vpop.xlane.xlu0 %304  ;;  %v472_v25 = vmax.f32 %v3957_v19, %v3956_v0  ;;  %v3963_v0 = vld [vmem:[#allocation60_spill] sm:$0xff] }
 0x10c   :  { %3949 = vst [vmem:[#allocation65_spill] sm:$0xff] %v3014_v29 }
 0x10d   :  { %470 = vmax.xlane.f32.xlu1 %v469_v54  ;;  %v607_v54 = vmax.f32 %v2796_v34, %v2798_v35  ;;  %v3964_v34 = vld [vmem:[#allocation82_spill] sm:$0xff] }
 0x10e   :  { %605 = vmax.xlane.f32.xlu0 %v604_v38  ;;  %v3018_v11 = vpop.xlane.xlu1 %313  ;;  %v3958_v38 = vld [vmem:[#allocation63_spill] sm:$0xff] }
 0x10f   :  { %3952 = vst [vmem:[#allocation72_spill] sm:$0xff] %v3018_v11  ;;  %v3022_v42 = vpop.xlane.xlu0 %310  ;;  %v565_v22 = vmax.f32 %v3959_v58, %v3958_v38  ;;  %v613_v58 = vmax.f32 %v2808_v33, %v2810_v31 }
 0x110   :  { %3955 = vst [vmem:[#allocation71_spill] sm:$0xff] %v3022_v42 }
 0x111   :  { %563 = vmax.xlane.f32.xlu1 %v562_v52  ;;  %v3961_v52 = vld [vmem:[#allocation38_spill] sm:$0xff] }
 0x112   :  { %518 = vmax.xlane.f32.xlu0 %v517_v13  ;;  %v3026_v41 = vpop.xlane.xlu1 %319  ;;  %v520_v42 = vmax.f32 %v3961_v52, %v3960_v47  ;;  %v3962_v13 = vld [vmem:[#allocation61_spill] sm:$0xff]  ;;  %v683_v52 = vlaneseq }
 0x113   :  { %v3030_v44 = vpop.xlane.xlu0 %316  ;;  %v568_v19 = vmax.f32 %v3963_v0, %v3962_v13 }
 0x114   :  { %v3070_v31 = vshrl.u32 %v683_v52, 7 }
 0x115   :  { %473 = vmax.xlane.f32.xlu1 %v472_v25  ;;  %v3965_v25 = vld [vmem:[#allocation81_spill] sm:$0xff] }
 0x116   :  { %608 = vmax.xlane.f32.xlu0 %v607_v54  ;;  %v3034_v8 = vpop.xlane.xlu1 %325  ;;  %v610_v29 = vmax.f32 %v3965_v25, %v3964_v34  ;;  %v616_v54 = vmax.f32 %v2804_v30, %v2806_v32  ;;  %v3064_v32 = vand.u32 127, %v683_v52  ;;  %3974 = vst [vmem:[#allocation70_spill] sm:$0xff] %v3070_v31 }
 0x117   :  { %v3038_v11 = vpop.xlane.xlu0 %322 }
 0x118   :  { %3971 = vst [vmem:[#allocation26_spill] sm:$0xff] %v3064_v32  ;;  %v753_v33 = vadd.s32 4294967288, %v3064_v32  ;;  %v767_v25 = vadd.s32 4294967272, %v3064_v32  ;;  %v781_v52 = vadd.s32 4294967256, %v3064_v32 }
 0x119   :  { %566 = vmax.xlane.f32.xlu1 %v565_v22 }
 0x11a   :  { %521 = vmax.xlane.f32.xlu0 %v520_v42  ;;  %v3042_v35 = vpop.xlane.xlu1 %331 }
 0x11b   :  { %v3046_v56 = vpop.xlane.xlu0 %328 }
 0x11d   :  { %569 = vmax.xlane.f32.xlu1 %v568_v19 }
 0x11e   :  { %611 = vmax.xlane.f32.xlu0 %v610_v29  ;;  %v3050_v38 = vpop.xlane.xlu1 %337 }
 0x11f   :  { %3966 = vst [vmem:[#allocation45_spill] sm:$0xff] %v3050_v38  ;;  %v3054_v22 = vpop.xlane.xlu0 %334 }
 0x121   :  { %617 = vmax.xlane.f32.xlu1 %v616_v54  ;;  %v760_v54 = vadd.s32 4294967280, %v3064_v32 }
 0x122   :  { %614 = vmax.xlane.f32.xlu0 %v613_v58  ;;  %v3056_v42 = vpop.xlane.xlu1 %343  ;;  %v365_v58 = vmul.f32 0.00390625, %v2834_v1  ;;  %v774_v1 = vadd.s32 4294967264, %v3064_v32 }
 0x123   :  { %3967 = vst [vmem:[#allocation44_spill] sm:$0xff] %v3056_v42  ;;  %v3058_v47 = vpop.xlane.xlu0 %340  ;;  %v3091_v42 = vsub.s32 %v3064_v32, %v3070_v31 }
 0x124   :  { %3968 = vst [vmem:[#allocation51_spill] sm:$0xff] %v3058_v47 }
 0x126   :  { %v3060_v13 = vpop.xlane.xlu1 %349 }
 0x127   :  { %3969 = vst [vmem:[#allocation50_spill] sm:$0xff] %v3060_v13  ;;  %v3062_v0 = vpop.xlane.xlu0 %346  ;;  %v366_v13 = vmul.f32 0.00390625, %v2842_v12  ;;  %v368_v12 = vmul.f32 0.00390625, %v2850_v18  ;;  %v3111_v18 = vsub.s32 %v774_v1, %v3070_v31 }
 0x128   :  { %3970 = vst [vmem:[#allocation27_spill] sm:$0xff] %v3062_v0  ;;  %v363_v0 = vmul.f32 0.00390625, %v2838_v6 }
 0x12a   :  { %v3066_v30 = vpop.xlane.xlu1 %355 }
 0x12b   :  { %3972 = vst [vmem:[#allocation15_spill] sm:$0xff] %v3066_v30  ;;  %v3068_v29 = vpop.xlane.xlu0 %352  ;;  %v364_v30 = vmul.f32 0.00390625, %v2846_v14  ;;  %v3095_v14 = vsub.s32 %v767_v25, %v3070_v31 }
 0x12c   :  { %3973 = vst [vmem:[#allocation14_spill] sm:$0xff] %v3068_v29  ;;  %v3083_v29 = vsub.s32 %v753_v33, %v3070_v31  ;;  %v3098_v33 = vsub.s32 %v760_v54, %v3070_v31 }
 0x12e   :  { %v3073_v19 = vpop.xlane.xlu1 %361 }
 0x12f   :  { %3975 = vst [vmem:[#allocation69_spill] sm:$0xff] %v3073_v19  ;;  %v3075_v34 = vpop.xlane.xlu0 %358  ;;  %v3087_v19 = vstv %s2173_s0 }
 0x130   :  { %3976 = vst [vmem:[#allocation49_spill] sm:$0xff] %v3075_v34 }
 0x132   :  { %v432_v34 = vpop.xlane.xlu1 %431 }
 0x133   :  { %v620_v47 = vadd.f32 %v432_v34, %v364_v30  ;;  %v429_v6 = vpop.xlane.xlu0 %428  ;;  %v3105_v30 = vsub.s32 %v781_v52, %v3070_v31  ;;  %v795_v34 = vadd.s32 4294967240, %v3064_v32  ;;  %v788_v52 = vadd.s32 4294967248, %v3064_v32 }
 0x134   :  { %v619_v38 = vadd.f32 %v429_v6, %v363_v0 }
 0x135   :  { %v757_v23 = vrot.slane %v620_v47, %v3083_v29  ;;  %v1138_v17 = vmul.f32 %v3087_v19, %v620_v47  ;;  %v3122_v24 = vsub.s32 %v795_v34, %v3070_v31 }
 0x136   :  { %v752_v25 = vrot.slane %v619_v38, %v3091_v42  ;;  %v1137_v54 = vmul.f32 %v3087_v19, %v619_v38  ;;  %v438_v61 = vpop.xlane.xlu1 %437  ;;  %v369_v38 = vmul.f32 0.00390625, %v2862_v26  ;;  %v3129_v26 = vsub.s32 %v788_v52, %v3070_v31 }
 0x137   :  { %v1272_v0 = vrot.slane %v1138_v17, %v3083_v29  ;;  %v622_v6 = vadd.f32 %v438_v61, %v366_v13  ;;  %v435_v47 = vpop.xlane.xlu0 %434 }
 0x138   :  { %v759_v59 = vsel %vm758_vm0, %v757_v23, %v752_v25  ;;  %v1268_v62 = vrot.slane %v1137_v54, %v3091_v42  ;;  %v621_v21 = vadd.f32 %v435_v47, %v365_v58 }
 0x139   :  { %v771_v36 = vrot.slane %v622_v6, %v3095_v14  ;;  %v1140_v1 = vmul.f32 %v3087_v19, %v622_v6  ;;  %v809_v6 = vadd.s32 4294967224, %v3064_v32 }
 0x13a   :  { %v1273_v61 = vsel %vm758_vm0, %v1272_v0, %v1268_v62  ;;  %v764_v17 = vrot.slane %v621_v21, %v3098_v33  ;;  %v1139_v13 = vmul.f32 %v3087_v19, %v621_v21  ;;  %v444_v23 = vpop.xlane.xlu1 %443  ;;  %v802_v0 = vadd.s32 4294967232, %v3064_v32 }
 0x13b   :  { %v1282_v58 = vrot.slane %v1140_v1, %v3095_v14  ;;  %v624_v25 = vadd.f32 %v444_v23, %v368_v12  ;;  %v441_v54 = vpop.xlane.xlu0 %440  ;;  %v372_v21 = vmul.f32 0.00390625, %v2866_v37 }
 0x13c   :  { %v766_v34 = vsel %vm765_vm1, %v764_v17, %v759_v59  ;;  %v1277_v47 = vrot.slane %v1139_v13, %v3098_v33  ;;  %v623_v62 = vadd.f32 %v441_v54, %v367_v4  ;;  %v371_v4 = vmul.f32 0.00390625, %v2870_v49 }
 0x13d   :  { %v785_v3 = vrot.slane %v624_v25, %v3105_v30  ;;  %v1142_v1 = vmul.f32 %v3087_v19, %v624_v25  ;;  %v773_v12 = vsel %vm772_vm2, %v771_v36, %v766_v34 }
 0x13e   :  { %v1278_v52 = vsel %vm765_vm1, %v1277_v47, %v1273_v61  ;;  %v778_v23 = vrot.slane %v623_v62, %v3111_v18  ;;  %v1141_v63 = vmul.f32 %v3087_v19, %v623_v62  ;;  %v450_v59 = vpop.xlane.xlu1 %449  ;;  %v3148_v61 = vsub.s32 %v809_v6, %v3070_v31 }
 0x13f   :  { %v1292_v17 = vrot.slane %v1142_v1, %v3105_v30  ;;  %v1283_v37 = vsel %vm772_vm2, %v1282_v58, %v1278_v52  ;;  %v626_v13 = vadd.f32 %v450_v59, %v370_v20  ;;  %v447_v54 = vpop.xlane.xlu0 %446 }
 0x140   :  { %v780_v25 = vsel %vm779_vm3, %v778_v23, %v773_v12  ;;  %v1287_v36 = vrot.slane %v1141_v63, %v3111_v18  ;;  %v625_v34 = vadd.f32 %v447_v54, %v369_v38  ;;  %v3157_v63 = vsub.s32 %v802_v0, %v3070_v31 }
 0x141   :  { %v799_v47 = vrot.slane %v626_v13, %v3122_v24  ;;  %v1144_v62 = vmul.f32 %v3087_v19, %v626_v13  ;;  %v787_v49 = vsel %vm786_vm4, %v785_v3, %v780_v25  ;;  %v380_v13 = vmul.f32 0.00390625, %v2898_v7 }
 0x142   :  { %v1288_v1 = vsel %vm779_vm3, %v1287_v36, %v1283_v37  ;;  %v792_v20 = vrot.slane %v625_v34, %v3129_v26  ;;  %v1143_v58 = vmul.f32 %v3087_v19, %v625_v34  ;;  %v456_v12 = vpop.xlane.xlu1 %455  ;;  %v379_v36 = vmul.f32 0.00390625, %v2902_v40 }
 0x143   :  { %v1302_v38 = vrot.slane %v1144_v62, %v3122_v24  ;;  %v1293_v6 = vsel %vm786_vm4, %v1292_v17, %v1288_v1  ;;  %v628_v52 = vadd.f32 %v456_v12, %v372_v21  ;;  %v453_v23 = vpop.xlane.xlu0 %452  ;;  %v395_v40 = vmul.f32 0.00390625, %v2966_v48 }
 0x144   :  { %v794_v3 = vsel %vm793_vm5, %v792_v20, %v787_v49  ;;  %v1297_v59 = vrot.slane %v1143_v58, %v3129_v26  ;;  %v627_v37 = vadd.f32 %v453_v23, %v371_v4  ;;  %v381_v23 = vmul.f32 0.00390625, %v2910_v45 }
 0x145   :  { %v813_v54 = vrot.slane %v628_v52, %v3148_v61  ;;  %v1146_v0 = vmul.f32 %v3087_v19, %v628_v52  ;;  %v801_v25 = vsel %vm800_vm6, %v799_v47, %v794_v3 }
 0x146   :  { %v1298_v21 = vsel %vm793_vm5, %v1297_v59, %v1293_v6  ;;  %v806_v17 = vrot.slane %v627_v37, %v3157_v63  ;;  %v1145_v34 = vmul.f32 %v3087_v19, %v627_v37  ;;  %v480_v62 = vpop.xlane.xlu1 %479 }
 0x147   :  { %v1312_v4 = vrot.slane %v1146_v0, %v3148_v61  ;;  %v1303_v49 = vsel %vm800_vm6, %v1302_v38, %v1298_v21  ;;  %v636_v7 = vadd.f32 %v480_v62, %v380_v13  ;;  %v477_v1 = vpop.xlane.xlu0 %476  ;;  %v382_v21 = vmul.f32 0.00390625, %v2906_v60 }
 0x148   :  { %v808_v20 = vsel %vm807_vm7, %v806_v17, %v801_v25  ;;  %v1307_v58 = vrot.slane %v1145_v34, %v3157_v63  ;;  %v635_v47 = vadd.f32 %v477_v1, %v379_v36  ;;  %v396_v34 = vmul.f32 0.00390625, %v2962_v15 }
 0x149   :  { %v865_v12 = vrot.slane %v636_v7, %v3083_v29  ;;  %v1154_v6 = vmul.f32 %v3087_v19, %v636_v7  ;;  %v3179_v52 = vsel %vm814_vm8, %v813_v54, %v808_v20 }
 0x14a   :  { %v1308_v38 = vsel %vm807_vm7, %v1307_v58, %v1303_v49  ;;  %v861_v3 = vrot.slane %v635_v47, %v3091_v42  ;;  %v1153_v59 = vmul.f32 %v3087_v19, %v635_v47  ;;  %v525_v37 = vpop.xlane.xlu1 %524 }
 0x14b   :  { %v1351_v13 = vrot.slane %v1154_v6, %v3083_v29  ;;  %v3186_v0 = vadd.f32 %v525_v37, %v395_v40  ;;  %v483_v48 = vpop.xlane.xlu0 %482  ;;  %v3189_v25 = vsel %vm814_vm8, %v1312_v4, %v1308_v38 }
 0x14c   :  { %v866_v54 = vsel %vm758_vm0, %v865_v12, %v861_v3  ;;  %v1347_v36 = vrot.slane %v1153_v59, %v3091_v42  ;;  %v637_v45 = vadd.f32 %v483_v48, %v381_v23  ;;  %v411_v12 = vmul.f32 0.00390625, %v3030_v44 }
 0x14d   :  { %v1169_v17 = vmul.f32 %v3087_v19, %v3186_v0  ;;  %v397_v23 = vmul.f32 0.00390625, %v2974_v39 }
 0x14e   :  { %v1352_v62 = vsel %vm758_vm0, %v1351_v13, %v1347_v36  ;;  %v870_v49 = vrot.slane %v637_v45, %v3098_v33  ;;  %v1155_v7 = vmul.f32 %v3087_v19, %v637_v45  ;;  %v486_v4 = vpop.xlane.xlu1 %485  ;;  %v383_v45 = vmul.f32 0.00390625, %v2918_v28 }
 0x14f   :  { %v1426_v1 = vrot.slane %v1169_v17, %v3091_v42  ;;  %v638_v20 = vadd.f32 %v486_v4, %v382_v21  ;;  %v528_v58 = vpop.xlane.xlu0 %527  ;;  %v412_v17 = vmul.f32 0.00390625, %v3026_v41 }
 0x150   :  { %v871_v47 = vsel %vm765_vm1, %v870_v49, %v866_v54  ;;  %v1356_v60 = vrot.slane %v1155_v7, %v3098_v33  ;;  %v3203_v40 = vadd.f32 %v528_v58, %v396_v34 }
 0x151   :  { %v875_v15 = vrot.slane %v638_v20, %v3095_v14  ;;  %v1156_v6 = vmul.f32 %v3087_v19, %v638_v20 }
 0x152   :  { %v1357_v38 = vsel %vm765_vm1, %v1356_v60, %v1352_v62  ;;  %v1170_v3 = vmul.f32 %v3087_v19, %v3203_v40  ;;  %v573_v59 = vpop.xlane.xlu1 %572 }
 0x153   :  { %v876_v37 = vsel %vm772_vm2, %v875_v15, %v871_v47  ;;  %v1361_v13 = vrot.slane %v1156_v6, %v3095_v14  ;;  %v3214_v48 = vadd.f32 %v573_v59, %v411_v12  ;;  %v531_v54 = vpop.xlane.xlu0 %530  ;;  %v413_v47 = vmul.f32 0.00390625, %v3038_v11 }
 0x154   :  { %v1430_v44 = vrot.slane %v1170_v3, %v3083_v29  ;;  %v3217_v36 = vadd.f32 %v531_v54, %v397_v23  ;;  %v399_v54 = vmul.f32 0.00390625, %v2982_v10 }
 0x155   :  { %v1362_v39 = vsel %vm772_vm2, %v1361_v13, %v1357_v38  ;;  %v1185_v21 = vmul.f32 %v3087_v19, %v3214_v48 }
 0x156   :  { %v1431_v34 = vsel %vm758_vm0, %v1430_v44, %v1426_v1  ;;  %v1171_v62 = vmul.f32 %v3087_v19, %v3217_v36  ;;  %v489_v49 = vpop.xlane.xlu1 %488  ;;  %v398_v1 = vmul.f32 0.00390625, %v2970_v53 }
 0x157   :  { %v1505_v7 = vrot.slane %v1185_v21, %v3091_v42  ;;  %v639_v4 = vadd.f32 %v489_v49, %v383_v45  ;;  %v576_v20 = vpop.xlane.xlu0 %575  ;;  %v384_v45 = vmul.f32 0.00390625, %v2914_v46 }
 0x158   :  { %v1435_v58 = vrot.slane %v1171_v62, %v3098_v33  ;;  %v3229_v28 = vadd.f32 %v576_v20, %v412_v17 }
 0x159   :  { %v880_v60 = vrot.slane %v639_v4, %v3111_v18  ;;  %v1157_v41 = vmul.f32 %v3087_v19, %v639_v4 }
 0x15a   :  { %v1436_v12 = vsel %vm765_vm1, %v1435_v58, %v1431_v34  ;;  %v1186_v15 = vmul.f32 %v3087_v19, %v3229_v28  ;;  %v579_v6 = vpop.xlane.xlu1 %578 }
 0x15b   :  { %v881_v23 = vsel %vm779_vm3, %v880_v60, %v876_v37  ;;  %v1366_v38 = vrot.slane %v1157_v41, %v3111_v18  ;;  %v3240_v3 = vadd.f32 %v579_v6, %v413_v47  ;;  %v534_v59 = vpop.xlane.xlu0 %533 }
 0x15c   :  { %v1509_v11 = vrot.slane %v1186_v15, %v3083_v29  ;;  %v3243_v13 = vadd.f32 %v534_v59, %v398_v1 }
 0x15d   :  { %v1367_v53 = vsel %vm779_vm3, %v1366_v38, %v1362_v39  ;;  %v1187_v44 = vmul.f32 %v3087_v19, %v3240_v3  ;;  %v385_v39 = vmul.f32 0.00390625, %v2926_v9 }
 0x15e   :  { %v1510_v37 = vsel %vm758_vm0, %v1509_v11, %v1505_v7  ;;  %v1172_v21 = vmul.f32 %v3087_v19, %v3243_v13  ;;  %v537_v17 = vpop.xlane.xlu1 %536  ;;  %v414_v7 = vmul.f32 0.00390625, %v3034_v8  ;;  %v415_v11 = vmul.f32 0.00390625, %v3046_v56 }
 0x15f   :  { %v1514_v34 = vrot.slane %v1187_v44, %v3098_v33  ;;  %v3254_v62 = vadd.f32 %v537_v17, %v399_v54  ;;  %v492_v49 = vpop.xlane.xlu0 %491  ;;  %v400_v44 = vmul.f32 0.00390625, %v2978_v16 }
 0x160   :  { %v1440_v10 = vrot.slane %v1172_v21, %v3095_v14  ;;  %v640_v4 = vadd.f32 %v492_v49, %v384_v45 }
 0x161   :  { %v1515_v20 = vsel %vm765_vm1, %v1514_v34, %v1510_v37  ;;  %v1173_v46 = vmul.f32 %v3087_v19, %v3254_v62 }
 0x162   :  { %v1441_v58 = vsel %vm772_vm2, %v1440_v10, %v1436_v12  ;;  %v885_v47 = vrot.slane %v640_v4, %v3105_v30  ;;  %v1158_v60 = vmul.f32 %v3087_v19, %v640_v4  ;;  %v495_v41 = vpop.xlane.xlu1 %494  ;;  %v401_v4 = vmul.f32 0.00390625, %v2990_v27 }
 0x163   :  { %v1445_v1 = vrot.slane %v1173_v46, %v3111_v18  ;;  %v641_v15 = vadd.f32 %v495_v41, %v385_v39  ;;  %v582_v6 = vpop.xlane.xlu0 %581  ;;  %v386_v39 = vmul.f32 0.00390625, %v2922_v2 }
 0x164   :  { %v886_v9 = vsel %vm786_vm4, %v885_v47, %v881_v23  ;;  %v1371_v38 = vrot.slane %v1158_v60, %v3105_v30  ;;  %v3268_v59 = vadd.f32 %v582_v6, %v414_v7 }
 0x165   :  { %v1446_v8 = vsel %vm779_vm3, %v1445_v1, %v1441_v58  ;;  %v890_v12 = vrot.slane %v641_v15, %v3129_v26  ;;  %v1159_v54 = vmul.f32 %v3087_v19, %v641_v15  ;;  %v387_v15 = vmul.f32 0.00390625, %v2934_v50 }
 0x166   :  { %v1372_v45 = vsel %vm786_vm4, %v1371_v38, %v1367_v53  ;;  %v1188_v37 = vmul.f32 %v3087_v19, %v3268_v59  ;;  %v585_v23 = vpop.xlane.xlu1 %584 }
 0x167   :  { %v891_v21 = vsel %vm793_vm5, %v890_v12, %v886_v9  ;;  %v1376_v17 = vrot.slane %v1159_v54, %v3129_v26  ;;  %v3280_v34 = vadd.f32 %v585_v23, %v415_v11  ;;  %v540_v56 = vpop.xlane.xlu0 %539  ;;  %v3306_v54 = vmul.f32 0.00390625, %v2874_v51 }
 0x168   :  { %v1519_v49 = vrot.slane %v1188_v37, %v3095_v14  ;;  %v3283_v10 = vadd.f32 %v540_v56, %v400_v44  ;;  %v373_v37 = vmul.f32 0.00390625, %v2878_v55 }
 0x169   :  { %v1377_v16 = vsel %vm793_vm5, %v1376_v17, %v1372_v45  ;;  %v1189_v53 = vmul.f32 %v3087_v19, %v3280_v34 }
 0x16a   :  { %v1520_v46 = vsel %vm772_vm2, %v1519_v49, %v1515_v20  ;;  %v1174_v7 = vmul.f32 %v3087_v19, %v3283_v10  ;;  %v543_v58 = vpop.xlane.xlu1 %542  ;;  %v416_v20 = vmul.f32 0.00390625, %v3042_v35 }
 0x16b   :  { %v1524_v47 = vrot.slane %v1189_v53, %v3111_v18  ;;  %v3294_v60 = vadd.f32 %v543_v58, %v401_v4  ;;  %v498_v41 = vpop.xlane.xlu0 %497  ;;  %v3319_v4 = vmul.f32 0.00390625, %v2882_v43  ;;  %v402_v53 = vmul.f32 0.00390625, %v2986_v5  ;;  %v3977_v43 = vld [vmem:[#allocation83_spill] sm:$0xff]  ;;  %v3979_v5 = vld [vmem:[#allocation84_spill] sm:$0xff] }
 0x16c   :  { %v1450_v27 = vrot.slane %v1174_v7, %v3105_v30  ;;  %v642_v1 = vadd.f32 %v498_v41, %v386_v39  ;;  %v3333_v41 = vmul.f32 0.00390625, %v3977_v43 }
 0x16d   :  { %v1525_v6 = vsel %vm779_vm3, %v1524_v47, %v1520_v46  ;;  %v1175_v2 = vmul.f32 %v3087_v19, %v3294_v60  ;;  %v3326_v46 = vmul.f32 0.00390625, %v2886_v57 }
 0x16e   :  { %v1451_v9 = vsel %vm786_vm4, %v1450_v27, %v1446_v8  ;;  %v895_v38 = vrot.slane %v642_v1, %v3122_v24  ;;  %v1160_v11 = vmul.f32 %v3087_v19, %v642_v1  ;;  %v501_v12 = vpop.xlane.xlu1 %500  ;;  %v417_v8 = vmul.f32 0.00390625, %v3054_v22  ;;  %3978 = vst [vmem:[#allocation48_spill] sm:$0xff] %v3333_v41 }
 0x16f   :  { %v1455_v44 = vrot.slane %v1175_v2, %v3129_v26  ;;  %v643_v50 = vadd.f32 %v501_v12, %v387_v15  ;;  %v588_v45 = vpop.xlane.xlu0 %587  ;;  %v3336_v27 = vmul.f32 0.00390625, %v3979_v5  ;;  %v3981_v15 = vld [vmem:[#allocation24_spill] sm:$0xff] }
 0x170   :  { %v896_v23 = vsel %vm800_vm6, %v895_v38, %v891_v21  ;;  %v1381_v35 = vrot.slane %v1160_v11, %v3122_v24  ;;  %v3312_v17 = vadd.f32 %v588_v45, %v416_v20  ;;  %v403_v57 = vmul.f32 0.00390625, %v3981_v15  ;;  %v3982_v38 = vld [vmem:[#allocation64_spill] sm:$0xff] }
 0x171   :  { %v1456_v56 = vsel %vm793_vm5, %v1455_v44, %v1451_v9  ;;  %v900_v49 = vrot.slane %v643_v50, %v3157_v63  ;;  %v1161_v51 = vmul.f32 %v3087_v19, %v643_v50  ;;  %v816_v9 = vadd.s32 4294967216, %v3064_v32  ;;  %v3983_v12 = vld [vmem:[#allocation68_spill] sm:$0xff] }
 0x172   :  { %v1382_v55 = vsel %vm800_vm6, %v1381_v35, %v1377_v16  ;;  %v1190_v21 = vmul.f32 %v3087_v19, %v3312_v17  ;;  %v591_v39 = vpop.xlane.xlu1 %590  ;;  %v388_v11 = vmul.f32 0.00390625, %v3982_v38  ;;  %v3348_v44 = vmul.f32 0.00390625, %v3983_v12  ;;  %v3984_v35 = vld [vmem:[#allocation67_spill] sm:$0xff] }
 0x173   :  { %v901_v22 = vsel %vm807_vm7, %v900_v49, %v896_v23  ;;  %v1386_v7 = vrot.slane %v1161_v51, %v3157_v63  ;;  %v3330_v58 = vadd.f32 %v591_v39, %v417_v8  ;;  %v546_v47 = vpop.xlane.xlu0 %545  ;;  %v389_v8 = vmul.f32 0.00390625, %v3984_v35  ;;  %v3985_v49 = vld [vmem:[#allocation43_spill] sm:$0xff]  ;;  %v3987_v39 = vld [vmem:[#allocation42_spill] sm:$0xff] }
 0x174   :  { %v1529_v16 = vrot.slane %v1190_v21, %v3105_v30  ;;  %v3339_v1 = vadd.f32 %v546_v47, %v402_v53  ;;  %v3355_v51 = vmul.f32 0.00390625, %v3985_v49  ;;  %v3988_v47 = vld [vmem:[#allocation47_spill] sm:$0xff]  ;;  %v3371_v38 = vsub.s32 %v816_v9, %v3070_v31 }
 0x175   :  { %v1387_v2 = vsel %vm807_vm7, %v1386_v7, %v1382_v55  ;;  %v1191_v20 = vmul.f32 %v3087_v19, %v3330_v58  ;;  %v3361_v7 = vmul.f32 0.00390625, %v3987_v39  ;;  %v3364_v43 = vmul.f32 0.00390625, %v3988_v47  ;;  %v3993_v39 = vld [vmem:[#allocation25_spill] sm:$0xff] }
 0x176   :  { %3980 = vst [vmem:[#allocation33_spill] sm:$0xff] %v3339_v1  ;;  %v1530_v50 = vsel %vm786_vm4, %v1529_v16, %v1525_v6  ;;  %v1176_v45 = vmul.f32 %v3087_v19, %v3339_v1  ;;  %v549_v23 = vpop.xlane.xlu1 %548  ;;  %v404_v47 = vmul.f32 0.00390625, %v3993_v39  ;;  %v3998_v39 = vld [vmem:[#allocation66_spill] sm:$0xff] }
 0x177   :  { %v1534_v53 = vrot.slane %v1191_v20, %v3129_v26  ;;  %v3358_v55 = vadd.f32 %v549_v23, %v403_v57  ;;  %v504_v21 = vpop.xlane.xlu0 %503  ;;  %3989 = vst [vmem:[#allocation13_spill] sm:$0xff] %v3364_v43  ;;  %v823_v57 = vadd.s32 4294967208, %v3064_v32  ;;  %v3990_v20 = vld [vmem:[#allocation45_spill] sm:$0xff] }
 0x178   :  { %v1460_v6 = vrot.slane %v1176_v45, %v3122_v24  ;;  %v644_v5 = vadd.f32 %v504_v21, %v388_v11  ;;  %v418_v12 = vmul.f32 0.00390625, %v3990_v20  ;;  %v3991_v11 = vld [vmem:[#allocation46_spill] sm:$0xff] }
 0x179   :  { %3986 = vst [vmem:[#allocation32_spill] sm:$0xff] %v3358_v55  ;;  %v1535_v16 = vsel %vm793_vm5, %v1534_v53, %v1530_v50  ;;  %v1177_v15 = vmul.f32 %v3087_v19, %v3358_v55  ;;  %v3379_v21 = vmul.f32 0.00390625, %v3991_v11  ;;  %v3391_v41 = vsub.s32 %v823_v57, %v3070_v31 }
 0x17a   :  { %v1461_v23 = vsel %vm800_vm6, %v1460_v6, %v1456_v56  ;;  %v905_v35 = vrot.slane %v644_v5, %v3148_v61  ;;  %v1162_v49 = vmul.f32 %v3087_v19, %v644_v5  ;;  %v459_v45 = vpop.xlane.xlu1 %458  ;;  %v830_v57 = vadd.s32 4294967200, %v3064_v32 }
 0x17b   :  { %3992 = vst [vmem:[#allocation12_spill] sm:$0xff] %v3379_v21  ;;  %v1465_v50 = vrot.slane %v1177_v15, %v3157_v63  ;;  %v629_v53 = vadd.f32 %v459_v45, %v373_v37  ;;  %v594_v9 = vpop.xlane.xlu0 %593  ;;  %v3995_v15 = vld [vmem:[#allocation29_spill] sm:$0xff] }
 0x17c   :  { %v906_v43 = vsel %vm814_vm8, %v905_v35, %v901_v22  ;;  %v1391_v20 = vrot.slane %v1162_v49, %v3148_v61  ;;  %v3385_v56 = vadd.f32 %v594_v9, %v418_v12  ;;  %v3394_v37 = vmul.f32 0.00390625, %v3995_v15  ;;  %v4000_v21 = vld [vmem:[#allocation65_spill] sm:$0xff] }
 0x17d   :  { %v1466_v6 = vsel %vm807_vm7, %v1465_v50, %v1461_v23  ;;  %v820_v5 = vrot.slane %v629_v53, %v3371_v38  ;;  %v1147_v11 = vmul.f32 %v3087_v19, %v629_v53  ;;  %v3997_v53 = vld [vmem:[#allocation28_spill] sm:$0xff]  ;;  %v3407_v15 = vmul.f32 0.00390625, %v3998_v39 }
 0x17e   :  { %3994 = vst [vmem:[#allocation76_spill] sm:$0xff] %v3385_v56  ;;  %v1392_v45 = vsel %vm814_vm8, %v1391_v20, %v1387_v2  ;;  %v1192_v22 = vmul.f32 %v3087_v19, %v3385_v56  ;;  %v552_v35 = vpop.xlane.xlu1 %551  ;;  %v405_v9 = vmul.f32 0.00390625, %v3997_v53  ;;  %v3411_v56 = vmul.f32 0.00390625, %v4000_v21 }
 0x17f   :  { %v822_v12 = vsel %vm821_vm9, %v820_v5, %v3179_v52  ;;  %v1317_v23 = vrot.slane %v1147_v11, %v3371_v38  ;;  %v3402_v49 = vadd.f32 %v552_v35, %v404_v47  ;;  %v507_v50 = vpop.xlane.xlu0 %506  ;;  %3999 = vst [vmem:[#allocation55_spill] sm:$0xff] %v3407_v15  ;;  %v837_v5 = vadd.s32 4294967192, %v3064_v32  ;;  %v4001_v11 = vld [vmem:[#allocation51_spill] sm:$0xff] }
 0x180   :  { %v1539_v2 = vrot.slane %v1192_v22, %v3122_v24  ;;  %v645_v20 = vadd.f32 %v507_v50, %v389_v8  ;;  %v419_v35 = vmul.f32 0.00390625, %v4001_v11 }
 0x181   :  { %3996 = vst [vmem:[#allocation75_spill] sm:$0xff] %v3402_v49  ;;  %v1318_v52 = vsel %vm821_vm9, %v1317_v23, %v3189_v25  ;;  %v1178_v47 = vmul.f32 %v3087_v19, %v3402_v49  ;;  %v3425_v25 = vsub.s32 %v830_v57, %v3070_v31  ;;  %v844_v23 = vadd.s32 4294967184, %v3064_v32 }
 0x182   :  { %v1540_v53 = vsel %vm800_vm6, %v1539_v2, %v1535_v16  ;;  %v910_v39 = vrot.slane %v645_v20, %v3371_v38  ;;  %v1163_v22 = vmul.f32 %v3087_v19, %v645_v20  ;;  %v462_v8 = vpop.xlane.xlu1 %461  ;;  %v851_v2 = vadd.s32 4294967176, %v3064_v32  ;;  %v4002_v20 = vld [vmem:[#allocation72_spill] sm:$0xff] }
 0x183   :  { %v1470_v21 = vrot.slane %v1178_v47, %v3148_v61  ;;  %v630_v50 = vadd.f32 %v462_v8, %v3306_v54  ;;  %v597_v15 = vpop.xlane.xlu0 %596  ;;  %v3434_v55 = vmul.f32 0.00390625, %v4002_v20  ;;  %v4004_v8 = vld [vmem:[#allocation71_spill] sm:$0xff] }
 0x184   :  { %v911_v49 = vsel %vm821_vm9, %v910_v39, %v906_v43  ;;  %v1396_v11 = vrot.slane %v1163_v22, %v3371_v38  ;;  %v3430_v16 = vadd.f32 %v597_v15, %v419_v35  ;;  %v3440_v1 = vmul.f32 0.00390625, %v4004_v8  ;;  %v4006_v8 = vld [vmem:[#allocation44_spill] sm:$0xff] }
 0x185   :  { %4003 = vst [vmem:[#allocation54_spill] sm:$0xff] %v3434_v55  ;;  %v1471_v54 = vsel %vm814_vm8, %v1470_v21, %v1466_v6  ;;  %v827_v47 = vrot.slane %v630_v50, %v3391_v41  ;;  %v1148_v57 = vmul.f32 %v3087_v19, %v630_v50  ;;  %v3446_v39 = vsub.s32 %v837_v5, %v3070_v31  ;;  %v4008_v5 = vld [vmem:[#allocation50_spill] sm:$0xff] }
 0x186   :  { %4005 = vst [vmem:[#allocation31_spill] sm:$0xff] %v3440_v1  ;;  %v1397_v43 = vsel %vm821_vm9, %v1396_v11, %v1392_v45  ;;  %v1193_v15 = vmul.f32 %v3087_v19, %v3430_v16  ;;  %v555_v35 = vpop.xlane.xlu1 %554  ;;  %v3453_v50 = vsub.s32 %v844_v23, %v3070_v31  ;;  %v420_v32 = vmul.f32 0.00390625, %v4006_v8  ;;  %v4011_v8 = vld [vmem:[#allocation14_spill] sm:$0xff] }
 0x187   :  { %v829_v22 = vsel %vm828_vm10, %v827_v47, %v822_v12  ;;  %v1322_v6 = vrot.slane %v1148_v57, %v3391_v41  ;;  %v3450_v21 = vadd.f32 %v555_v35, %v405_v9  ;;  %v510_v20 = vpop.xlane.xlu0 %509  ;;  %v3459_v55 = vsub.s32 %v851_v2, %v3070_v31  ;;  %v4009_v12 = vld [vmem:[#allocation27_spill] sm:$0xff]  ;;  %v4012_v31 = vld [vmem:[#allocation69_spill] sm:$0xff] }
 0x188   :  { %v1544_v45 = vrot.slane %v1193_v15, %v3157_v63  ;;  %v646_v11 = vadd.f32 %v510_v20, %v3348_v44  ;;  %v3462_v1 = vmul.f32 0.00390625, %v4008_v5  ;;  %v421_v47 = vmul.f32 0.00390625, %v4009_v12  ;;  %v4010_v57 = vld [vmem:[#allocation15_spill] sm:$0xff] }
 0x189   :  { %4007 = vst [vmem:[#allocation30_spill] sm:$0xff] %v3459_v55  ;;  %v1323_v9 = vsel %vm828_vm10, %v1322_v6, %v1318_v52  ;;  %v1179_v23 = vmul.f32 %v3087_v19, %v3450_v21  ;;  %v3469_v35 = vmul.f32 0.00390625, %v4010_v57  ;;  %v3475_v5 = vmul.f32 0.00390625, %v4011_v8 }
 0x18a   :  { %v1545_v15 = vsel %vm807_vm7, %v1544_v45, %v1540_v53  ;;  %v915_v44 = vrot.slane %v646_v11, %v3391_v41  ;;  %v1164_v2 = vmul.f32 %v3087_v19, %v646_v11  ;;  %v465_v20 = vpop.xlane.xlu1 %464  ;;  %v3478_v12 = vmul.f32 0.00390625, %v4012_v31 }
 0x18b   :  { %v1475_v52 = vrot.slane %v1179_v23, %v3371_v38  ;;  %v631_v6 = vadd.f32 %v465_v20, %v3326_v46  ;;  %v600_v55 = vpop.xlane.xlu0 %599  ;;  %v944_v57 = vrot.slane %v3203_v40, %v3083_v29  ;;  %v1023_v8 = vrot.slane %v3229_v28, %v3083_v29  ;;  %v4014_v20 = vld [vmem:[#allocation49_spill] sm:$0xff] }
 0x18c   :  { %4013 = vst [vmem:[#allocation19_spill] sm:$0xff] %v3478_v12  ;;  %v916_v53 = vsel %vm828_vm10, %v915_v44, %v911_v49  ;;  %v1401_v45 = vrot.slane %v1164_v2, %v3391_v41  ;;  %v3486_v11 = vadd.f32 %v600_v55, %v420_v32  ;;  %v3494_v12 = vmul.f32 0.00390625, %v4014_v20 }
 0x18d   :  { %v1476_v31 = vsel %vm821_vm9, %v1475_v52, %v1471_v54  ;;  %v834_v23 = vrot.slane %v631_v6, %v3425_v25  ;;  %v1149_v46 = vmul.f32 %v3087_v19, %v631_v6  ;;  %v940_v40 = vrot.slane %v3186_v0, %v3091_v42 }
 0x18e   :  { %v1402_v49 = vsel %vm828_vm10, %v1401_v45, %v1397_v43  ;;  %v1194_v32 = vmul.f32 %v3087_v19, %v3486_v11  ;;  %v558_v55 = vpop.xlane.xlu1 %557  ;;  %v1019_v29 = vrot.slane %v3214_v48, %v3091_v42  ;;  %v949_v0 = vrot.slane %v3217_v36, %v3098_v33 }
 0x18f   :  { %v836_v28 = vsel %vm835_vm11, %v834_v23, %v829_v22  ;;  %v1327_v54 = vrot.slane %v1149_v46, %v3425_v25  ;;  %v3506_v44 = vadd.f32 %v558_v55, %v3394_v37  ;;  %v513_v2 = vpop.xlane.xlu0 %512  ;;  %v945_v52 = vsel %vm758_vm0, %v944_v57, %v940_v40 }
 0x190   :  { %v1549_v43 = vrot.slane %v1194_v32, %v3148_v61  ;;  %v647_v6 = vadd.f32 %v513_v2, %v3361_v7  ;;  %v1024_v45 = vsel %vm758_vm0, %v1023_v8, %v1019_v29  ;;  %v1028_v42 = vrot.slane %v3240_v3, %v3098_v33 }
 0x191   :  { %v1328_v48 = vsel %vm835_vm11, %v1327_v54, %v1323_v9  ;;  %v1180_v37 = vmul.f32 %v3087_v19, %v3506_v44  ;;  %v954_v22 = vrot.slane %v3243_v13, %v3095_v14  ;;  %v959_v8 = vrot.slane %v3254_v62, %v3111_v18 }
 0x192   :  { %v1550_v57 = vsel %vm814_vm8, %v1549_v43, %v1545_v15  ;;  %v920_v36 = vrot.slane %v647_v6, %v3425_v25  ;;  %v1165_v23 = vmul.f32 %v3087_v19, %v647_v6  ;;  %v468_v7 = vpop.xlane.xlu1 %467  ;;  %v1033_v33 = vrot.slane %v3268_v59, %v3095_v14 }
 0x193   :  { %v1480_v3 = vrot.slane %v1180_v37, %v3391_v41  ;;  %v632_v9 = vadd.f32 %v468_v7, %v3319_v4  ;;  %v603_v46 = vpop.xlane.xlu0 %602  ;;  %v1038_v13 = vrot.slane %v3280_v34, %v3111_v18  ;;  %v964_v62 = vrot.slane %v3283_v10, %v3105_v30 }
 0x194   :  { %v921_v15 = vsel %vm835_vm11, %v920_v36, %v916_v53  ;;  %v1406_v20 = vrot.slane %v1165_v23, %v3425_v25  ;;  %v3534_v40 = vadd.f32 %v603_v46, %v421_v47  ;;  %v950_v32 = vsel %vm765_vm1, %v949_v0, %v945_v52 }
 0x195   :  { %v1481_v14 = vsel %vm828_vm10, %v1480_v3, %v1476_v31  ;;  %v841_v59 = vrot.slane %v632_v9, %v3446_v39  ;;  %v1150_v4 = vmul.f32 %v3087_v19, %v632_v9  ;;  %v1029_v18 = vsel %vm765_vm1, %v1028_v42, %v1024_v45 }
 0x196   :  { %v1407_v34 = vsel %vm835_vm11, %v1406_v20, %v1402_v49  ;;  %v1195_v47 = vmul.f32 %v3087_v19, %v3534_v40  ;;  %v561_v53 = vpop.xlane.xlu1 %560  ;;  %v955_v55 = vsel %vm772_vm2, %v954_v22, %v950_v32  ;;  %v1034_v52 = vsel %vm772_vm2, %v1033_v33, %v1029_v18  ;;  %v4019_v18 = vld [vmem:[#allocation55_spill] sm:$0xff] }
 0x197   :  { %v843_v10 = vsel %vm842_vm12, %v841_v59, %v836_v28  ;;  %v1332_v31 = vrot.slane %v1150_v4, %v3446_v39  ;;  %v3550_v29 = vadd.f32 %v561_v53, %v3411_v56  ;;  %v516_v54 = vpop.xlane.xlu0 %515  ;;  %v960_v2 = vsel %vm779_vm3, %v959_v8, %v955_v55  ;;  %v4018_v59 = vld [vmem:[#allocation75_spill] sm:$0xff] }
 0x198   :  { %v1554_v49 = vrot.slane %v1195_v47, %v3371_v38  ;;  %v648_v0 = vadd.f32 %v516_v54, %v3355_v51  ;;  %v1039_v43 = vsel %vm779_vm3, %v1038_v13, %v1034_v52  ;;  %v965_v6 = vsel %vm786_vm4, %v964_v62, %v960_v2  ;;  %v4017_v13 = vld [vmem:[#allocation76_spill] sm:$0xff] }
 0x199   :  { %v1333_v28 = vsel %vm842_vm12, %v1332_v31, %v1328_v48  ;;  %v1181_v45 = vmul.f32 %v3087_v19, %v3550_v29  ;;  %v969_v56 = vrot.slane %v3294_v60, %v3129_v26  ;;  %v1043_v51 = vrot.slane %v3312_v17, %v3105_v30  ;;  %v4015_v60 = vld [vmem:[#allocation33_spill] sm:$0xff]  ;;  %v4016_v30 = vld [vmem:[#allocation32_spill] sm:$0xff] }
 0x19a   :  { %v1555_v42 = vsel %vm821_vm9, %v1554_v49, %v1550_v57  ;;  %v925_v37 = vrot.slane %v648_v0, %v3446_v39  ;;  %v1166_v22 = vmul.f32 %v3087_v19, %v648_v0  ;;  %v471_v36 = vpop.xlane.xlu1 %470  ;;  %v1048_v23 = vrot.slane %v3330_v58, %v3129_v26  ;;  %v4020_v31 = vld [vmem:[#allocation12_spill] sm:$0xff] }
 0x19b   :  { %v1485_v48 = vrot.slane %v1181_v45, %v3425_v25  ;;  %v633_v7 = vadd.f32 %v471_v36, %v3336_v27  ;;  %v606_v8 = vpop.xlane.xlu0 %605  ;;  %v974_v33 = vrot.slane %v4015_v60, %v3122_v24  ;;  %v979_v26 = vrot.slane %v4016_v30, %v3157_v63  ;;  %v4021_v36 = vld [vmem:[#allocation48_spill] sm:$0xff] }
 0x19c   :  { %v3575_v57 = vsel %vm842_vm12, %v925_v37, %v921_v15  ;;  %v1411_v3 = vrot.slane %v1166_v22, %v3446_v39  ;;  %v3579_v9 = vadd.f32 %v606_v8, %v3462_v1  ;;  %v970_v46 = vsel %vm793_vm5, %v969_v56, %v965_v6  ;;  %v4022_v8 = vld [vmem:[#allocation30_spill] sm:$0xff] }
 0x19d   :  { %v1486_v17 = vsel %vm835_vm11, %v1485_v48, %v1481_v14  ;;  %v848_v58 = vrot.slane %v633_v7, %v3453_v50  ;;  %v1151_v27 = vmul.f32 %v3087_v19, %v633_v7  ;;  %v1053_v15 = vrot.slane %v4017_v13, %v3122_v24 }
 0x19e   :  { %v1412_v20 = vsel %vm842_vm12, %v1411_v3, %v1407_v34  ;;  %v1196_v1 = vmul.f32 %v3087_v19, %v3579_v9  ;;  %v564_v62 = vpop.xlane.xlu1 %563  ;;  %v984_v4 = vrot.slane %v4018_v59, %v3148_v61  ;;  %v1044_v55 = vsel %vm786_vm4, %v1043_v51, %v1039_v43 }
 0x19f   :  { %v850_v14 = vsel %vm849_vm13, %v848_v58, %v843_v10  ;;  %v1337_v32 = vrot.slane %v1151_v27, %v3453_v50  ;;  %v3597_v47 = vadd.f32 %v564_v62, %v4019_v18  ;;  %v519_v53 = vpop.xlane.xlu0 %518  ;;  %v975_v24 = vsel %vm800_vm6, %v974_v33, %v970_v46 }
 0x1a0   :  { %v1559_v34 = vrot.slane %v1196_v1, %v3391_v41  ;;  %v649_v54 = vadd.f32 %v519_v53, %v4020_v31  ;;  %v1049_v2 = vsel %vm793_vm5, %v1048_v23, %v1044_v55  ;;  %v980_v52 = vsel %vm807_vm7, %v979_v26, %v975_v24  ;;  %v4025_v31 = vld [vmem:[#allocation54_spill] sm:$0xff] }
 0x1a1   :  { %v1338_v10 = vsel %vm849_vm13, %v1337_v32, %v1333_v28  ;;  %v1182_v49 = vmul.f32 %v3087_v19, %v3597_v47  ;;  %v1058_v0 = vrot.slane %v3430_v16, %v3157_v63  ;;  %v989_v43 = vrot.slane %v3450_v21, %v3371_v38 }
 0x1a2   :  { %v1560_v6 = vsel %vm828_vm10, %v1559_v34, %v1555_v42  ;;  %v1167_v45 = vmul.f32 %v3087_v19, %v649_v54  ;;  %v474_v56 = vpop.xlane.xlu1 %473  ;;  %v1054_v37 = vsel %vm800_vm6, %v1053_v15, %v1049_v2  ;;  %v985_v22 = vsel %vm814_vm8, %v984_v4, %v980_v52  ;;  %v4024_v15 = vld [vmem:[#allocation13_spill] sm:$0xff] }
 0x1a3   :  { %v1490_v28 = vrot.slane %v1182_v49, %v3446_v39  ;;  %v634_v51 = vadd.f32 %v474_v56, %v4021_v36  ;;  %v609_v23 = vpop.xlane.xlu0 %608  ;;  %v1063_v63 = vrot.slane %v3486_v11, %v3148_v61  ;;  %v994_v16 = vrot.slane %v3506_v44, %v3391_v41 }
 0x1a4   :  { %v1416_v21 = vrot.slane %v1167_v45, %v3453_v50  ;;  %v679_v42 = vadd.f32 %v609_v23, %v3475_v5  ;;  %v1068_v48 = vrot.slane %v3534_v40, %v3371_v38  ;;  %v1059_v3 = vsel %vm807_vm7, %v1058_v0, %v1054_v37  ;;  %v4023_v40 = vld [vmem:[#allocation31_spill] sm:$0xff] }
 0x1a5   :  { %v1491_v7 = vsel %vm842_vm12, %v1490_v28, %v1486_v17  ;;  %v855_v60 = vrot.slane %v634_v51, %v4022_v8  ;;  %v1152_v33 = vmul.f32 %v3087_v19, %v634_v51  ;;  %v990_v61 = vsel %vm821_vm9, %v989_v43, %v985_v22  ;;  %v4026_v28 = vld [vmem:[#allocation19_spill] sm:$0xff] }
 0x1a6   :  { %v1417_v11 = vsel %vm849_vm13, %v1416_v21, %v1412_v20  ;;  %v1197_v44 = vmul.f32 %v3087_v19, %v679_v42  ;;  %v567_v30 = vpop.xlane.xlu1 %566  ;;  %v930_v5 = vrot.slane %v649_v54, %v3453_v50  ;;  %v1064_v27 = vsel %vm814_vm8, %v1063_v63, %v1059_v3 }
 0x1a7   :  { %v857_v26 = vsel %vm856_vm14, %v855_v60, %v850_v14  ;;  %v1342_v38 = vrot.slane %v1152_v33, %v4022_v8  ;;  %v665_v17 = vadd.f32 %v567_v30, %v4023_v40  ;;  %v522_v58 = vpop.xlane.xlu0 %521  ;;  %v995_v46 = vsel %vm828_vm10, %v994_v16, %v990_v61 }
 0x1a8   :  { %v1564_v13 = vrot.slane %v1197_v44, %v3425_v25  ;;  %v650_v20 = vadd.f32 %v522_v58, %v4024_v15  ;;  %v1069_v1 = vsel %vm821_vm9, %v1068_v48, %v1064_v27  ;;  %v999_v62 = vrot.slane %v3550_v29, %v3425_v25 }
 0x1a9   :  { %v1343_v59 = vsel %vm856_vm14, %v1342_v38, %v1338_v10  ;;  %v1183_v4 = vmul.f32 %v3087_v19, %v665_v17  ;;  %v1073_v14 = vrot.slane %v3579_v9, %v3391_v41  ;;  %vm1097_vm0 = vcmask 1042434  }
 0x1aa   :  { %v1565_v32 = vsel %vm835_vm11, %v1564_v13, %v1560_v6  ;;  %v935_v18 = vrot.slane %v650_v20, %v4022_v8  ;;  %v1168_v53 = vmul.f32 %v3087_v19, %v650_v20  ;;  %v570_v55 = vpop.xlane.xlu1 %569  ;;  %v1004_v24 = vrot.slane %v3597_v47, %v3446_v39 }
 0x1ab   :  { %v931_v29 = vsel %vm849_vm13, %v930_v5, %v3575_v57  ;;  %v1495_v34 = vrot.slane %v1183_v4, %v3453_v50  ;;  %v666_v54 = vadd.f32 %v570_v55, %v4025_v31  ;;  %v612_v2 = vpop.xlane.xlu0 %611  ;;  %v1078_v41 = vrot.slane %v679_v42, %v3425_v25 }
 0x1ac   :  { %v936_v9 = vsel %vm856_vm14, %v935_v18, %v931_v29  ;;  %v1421_v52 = vrot.slane %v1168_v53, %v4022_v8  ;;  %v680_v10 = vadd.f32 %v612_v2, %v3469_v35  ;;  %v1009_v49 = vrot.slane %v665_v17, %v3453_v50 }
 0x1ad   :  { %v1496_v47 = vsel %vm849_vm13, %v1495_v34, %v1491_v7  ;;  %v1096_v0 = vsel %vm1095_vm15, %v936_v9, %v857_v26  ;;  %v1184_v57 = vmul.f32 %v3087_v19, %v666_v54  ;;  %v1000_v43 = vsel %vm835_vm11, %v999_v62, %v995_v46 }
 0x1ae   :  { %v1422_v6 = vsel %vm856_vm14, %v1421_v52, %v1417_v11  ;;  %v1014_v25 = vrot.slane %v666_v54, %v4022_v8  ;;  %v1198_v45 = vmul.f32 %v3087_v19, %v680_v10  ;;  %v618_v56 = vpop.xlane.xlu1 %617  ;;  %v1074_v37 = vsel %vm828_vm10, %v1073_v14, %v1069_v1 }
 0x1af   :  { %v1500_v35 = vrot.slane %v1184_v57, %v4022_v8  ;;  %v1083_v22 = vrot.slane %v680_v10, %v3446_v39  ;;  %v682_v36 = vadd.f32 %v618_v56, %v4026_v28  ;;  %v615_v51 = vpop.xlane.xlu0 %614  ;;  %v1005_v23 = vsel %vm842_vm12, %v1004_v24, %v1000_v43 }
 0x1b0   :  { %v1079_v63 = vsel %vm835_vm11, %v1078_v41, %v1074_v37  ;;  %v1569_v16 = vrot.slane %v1198_v45, %v3446_v39  ;;  %v681_v21 = vadd.f32 %v615_v51, %v3494_v12  ;;  %v1010_v42 = vsel %vm849_vm13, %v1009_v49, %v1005_v23 }
 0x1b1   :  { %v1501_v48 = vsel %vm856_vm14, %v1500_v35, %v1496_v47  ;;  %v1093_v7 = vrot.slane %v682_v36, %v4022_v8  ;;  %v1200_v60 = vmul.f32 %v3087_v19, %v682_v36  ;;  %v1015_v33 = vsel %vm856_vm14, %v1014_v25, %v1010_v42 }
 0x1b2   :  { %v1570_v3 = vsel %vm842_vm12, %v1569_v16, %v1565_v32  ;;  %v1088_v61 = vrot.slane %v681_v21, %v3453_v50  ;;  %v1199_v11 = vmul.f32 %v3087_v19, %v681_v21  ;;  %v1084_v39 = vsel %vm842_vm12, %v1083_v22, %v1079_v63  ;;  %v4028_v16 = vld [vmem:[#allocation70_spill] sm:$0xff] }
 0x1b3   :  { %v1579_v12 = vrot.slane %v1200_v60, %v4022_v8  ;;  %vm1099_vm1 = vcmask 1043459   ;;  %v1581_v44 = vsel %vm1095_vm15, %v1422_v6, %v1343_v59  ;;  %v1098_v38 = vsel %vm1097_vm0, %v1015_v33, %v1096_v0 }
 0x1b4   :  { %v1089_v30 = vsel %vm849_vm13, %v1088_v61, %v1084_v39  ;;  %v1574_v5 = vrot.slane %v1199_v11, %v3453_v50  ;;  %v1582_v26 = vsel %vm1097_vm0, %v1501_v48, %v1581_v44  ;;  %v4027_v50 = vld [vmem:[#allocation26_spill] sm:$0xff]  ;;  %v1121_v15 = vstv %s2171_s9 }
 0x1b5   :  { %v1094_v40 = vsel %vm856_vm14, %v1093_v7, %v1089_v30  ;;  %v1115_v27 = vadd.s32 4294967294, %v4027_v50  ;;  %v1104_v46 = vadd.s32 4294967293, %v4027_v50  ;;  %v1126_v13 = vadd.s32 4294967295, %v4027_v50  ;;  %v2193_v44 = vld [vmem:[#allocation3 + $0x10] sm:$0xff] }
 0x1b6   :  { %v1575_v17 = vsel %vm849_vm13, %v1574_v5, %v1570_v3  ;;  %v1100_v19 = vsel %vm1099_vm1, %v1094_v40, %v1098_v38  ;;  %v1110_v20 = vstv %s1109_s10  ;;  %v1599_v14 = vadd.s32 2, %v4027_v50  ;;  %v2194_v5 = vld [vmem:[#allocation3 + $0x18] sm:$0xff]  ;;  %v2195_v38 = vld [vmem:[#allocation3] sm:$0xff] }
 0x1b7   :  { %1113 = vrot.lane.b32.xlu1 %v1100_v19, %s2387_s30  ;;  %1102 = vrot.lane.b32.xlu0 %v1100_v19, %s2388_s4  ;;  %v1580_v8 = vsel %vm856_vm14, %v1579_v12, %v1575_v17  ;;  %vm1116_vm2 = vcmp.ge.s32.totalorder %v1115_v27, 0  ;;  %vm1105_vm3 = vcmp.ge.s32.totalorder %v1104_v46, 0  ;;  %vm1127_vm4 = vcmp.ge.s32.totalorder %v1126_v13, 0  ;;  %v2196_v17 = vld [vmem:[#allocation3 + $0x8] sm:$0xff]  ;;  %v2198_v46 = vld [vmem:[#allocation3 + $0x38] sm:$0xff] }
 0x1b8   :  { %v1583_v58 = vsel %vm1099_vm1, %v1580_v8, %v1582_v26  ;;  %v1588_v53 = vadd.s32 1, %v4027_v50  ;;  %v1132_v55 = vstv %s2172_s11  ;;  %vm1601_vm5 = vcmp.lt.s32.totalorder %v1599_v14, 128  ;;  %v2201_v14 = vld [vmem:[#allocation3 + $0x50] sm:$0xff] }
 0x1b9   :  { %v1610_v2 = vadd.s32 3, %v4027_v50  ;;  %v1594_v41 = vstv %s2174_s12  ;;  %v1605_v10 = vstv %s2175_s13  ;;  %v1616_v43 = vstv %s2176_s14  ;;  %v2197_v50 = vld [vmem:[#allocation3 + $0x30] sm:$0xff] }
 0x1ba   :  { %vm1590_vm6 = vcmp.lt.s32.totalorder %v1588_v53, 128  ;;  %v1621_v22 = vstv %s1620_s17  ;;  %v1631_v21 = vsub.s32 0, %v4028_v16  ;;  %v1698_v7 = vsub.s32 1, %v4028_v16 }
 0x1bb   :  { %1124 = vrot.lane.b32.xlu1 %v1100_v19, %s2389_s5  ;;  %1597 = vrot.lane.b32.xlu0 %v1100_v19, %s2390_s6  ;;  %vm1612_vm7 = vcmp.lt.s32.totalorder %v1610_v2, 128  ;;  %v1765_v33 = vsub.s32 2, %v4028_v16  ;;  %v1832_v61 = vsub.s32 3, %v4028_v16  ;;  %v2205_v2 = vld [vmem:[#allocation3 + $0x70] sm:$0xff]  ;;  %v2214_v16 = vld [vmem:[#allocation3 + $0xb8] sm:$0xff] }
 0x1bf   :  { %1586 = vrot.lane.b32.xlu1 %v1100_v19, %s2391_s7 }
 0x1c3   :  { %1608 = vrot.lane.b32.xlu1 %v1100_v19, %s2392_s8 }
 0x229   :  { %v1114_v1 = vpop.permute.xlu1 %1113  ;;  %v1103_v62 = vpop.permute.xlu0 %1102 }
 0x22a   :  { %v1119_v59 = vsel %vm1116_vm2, %v1114_v1, 0.0  ;;  %v1108_v4 = vsel %vm1105_vm3, %v1103_v62, 0.0  ;;  %v2200_v1 = vld [vmem:[#allocation3 + $0x28] sm:$0xff] }
 0x22b   :  { %v1122_v32 = vmul.f32 %v1121_v15, %v1119_v59  ;;  %v1111_v18 = vmul.f32 %v1110_v20, %v1108_v4  ;;  %v2199_v15 = vld [vmem:[#allocation3 + $0x20] sm:$0xff] }
 0x22d   :  { %v1125_v24 = vpop.permute.xlu1 %1124  ;;  %v1123_v34 = vadd.f32 %v1122_v32, %v1111_v18  ;;  %v1598_v54 = vpop.permute.xlu0 %1597  ;;  %v2202_v18 = vld [vmem:[#allocation3 + $0x58] sm:$0xff] }
 0x22e   :  { %v1130_v29 = vsel %vm1127_vm4, %v1125_v24, 0.0  ;;  %v1603_v49 = vsel %vm1601_vm5, %v1598_v54, 0.0 }
 0x22f   :  { %v1133_v31 = vmul.f32 %v1132_v55, %v1130_v29  ;;  %v1606_v6 = vmul.f32 %v1605_v10, %v1603_v49  ;;  %v2203_v55 = vld [vmem:[#allocation3 + $0x40] sm:$0xff]  ;;  %v2204_v29 = vld [vmem:[#allocation3 + $0x48] sm:$0xff] }
 0x230   :  { %v2207_v10 = vld [vmem:[#allocation3 + $0x60] sm:$0xff] }
 0x231   :  { %v1134_v9 = vadd.f32 %v1133_v31, %v1123_v34  ;;  %v1587_v52 = vpop.permute.xlu1 %1586 }
 0x232   :  { %v1592_v47 = vsel %vm1590_vm6, %v1587_v52, 0.0 }
 0x233   :  { %v1585_v0 = vadd.f32 %v1583_v58, %v1134_v9  ;;  %v1595_v57 = vmul.f32 %v1594_v41, %v1592_v47  ;;  %v2206_v9 = vld [vmem:[#allocation3 + $0x78] sm:$0xff]  ;;  %v2208_v47 = vld [vmem:[#allocation3 + $0x68] sm:$0xff] }
 0x235   :  { %v1596_v25 = vadd.f32 %v1595_v57, %v1585_v0  ;;  %v1609_v45 = vpop.permute.xlu1 %1608 }
 0x236   :  { %v1614_v56 = vsel %vm1612_vm7, %v1609_v45, 0.0  ;;  %v2210_v45 = vld [vmem:[#allocation3 + $0x98] sm:$0xff] }
 0x237   :  { %v1607_v37 = vadd.f32 %v1606_v6, %v1596_v25  ;;  %v1617_v35 = vmul.f32 %v1616_v43, %v1614_v56  ;;  %v2209_v6 = vld [vmem:[#allocation3 + $0x90] sm:$0xff] }
 0x239   :  { %v1618_v28 = vadd.f32 %v1617_v35, %v1607_v37  ;;  %v2211_v37 = vld [vmem:[#allocation3 + $0x80] sm:$0xff] }
 0x23b   :  { %v1622_v36 = vadd.f32 %v1621_v22, %v1618_v28  ;;  %v2212_v22 = vld [vmem:[#allocation3 + $0x88] sm:$0xff] }
 0x23d   :  { %v2177_v51 = vmul.f32 -1.442695, %v1622_v36 }
 0x23f   :  { %2189 = vpow2.f32 %v2177_v51 }
 0x249   :  { %v2190_v23 = vpop.eup %2189 }
 0x24a   :  { %v1626_v63 = vadd.f32 1.0, %v2190_v23  ;;  %v2213_v23 = vld [vmem:[#allocation3 + $0xb0] sm:$0xff] }
 0x24c   :  { %2191 = vrcp.f32 %v1626_v63 }
 0x256   :  { %v2192_v42 = vpop.eup %2191 }
 0x257   :  { %v1632_v48 = vrot.slane %v2192_v42, %v1631_v21  ;;  %v1699_v60 = vrot.slane %v2192_v42, %v1698_v7  ;;  %v1766_v3 = vrot.slane %v2192_v42, %v1765_v33  ;;  %v1833_v11 = vrot.slane %v2192_v42, %v1832_v61  ;;  %v2215_v42 = vld [vmem:[#allocation3 + $0xa0] sm:$0xff]  ;;  %v2216_v7 = vld [vmem:[#allocation3 + $0xa8] sm:$0xff]  ;;  %v2217_v61 = vld [vmem:[#allocation3 + $0xd0] sm:$0xff] }
 0x259   :  { %1638 = vbcast.lane.b32.xlu1 %v1632_v48, 264  ;;  %1634 = vbcast.lane.b32.xlu0 %v1632_v48, 256 }
 0x25d   :  { %1646 = vbcast.lane.b32.xlu1 %v1632_v48, 280  ;;  %1642 = vbcast.lane.b32.xlu0 %v1632_v48, 272 }
 0x261   :  { %1654 = vbcast.lane.b32.xlu1 %v1632_v48, 296  ;;  %1650 = vbcast.lane.b32.xlu0 %v1632_v48, 288 }
 0x265   :  { %1662 = vbcast.lane.b32.xlu1 %v1632_v48, 312  ;;  %1658 = vbcast.lane.b32.xlu0 %v1632_v48, 304 }
 0x269   :  { %1670 = vbcast.lane.b32.xlu1 %v1632_v48, 328  ;;  %1666 = vbcast.lane.b32.xlu0 %v1632_v48, 320 }
 0x26d   :  { %1678 = vbcast.lane.b32.xlu1 %v1632_v48, 344  ;;  %1674 = vbcast.lane.b32.xlu0 %v1632_v48, 336 }
 0x271   :  { %1686 = vbcast.lane.b32.xlu1 %v1632_v48, 360  ;;  %1682 = vbcast.lane.b32.xlu0 %v1632_v48, 352 }
 0x275   :  { %1694 = vbcast.lane.b32.xlu1 %v1632_v48, 376  ;;  %1690 = vbcast.lane.b32.xlu0 %v1632_v48, 368 }
 0x279   :  { %1705 = vbcast.lane.b32.xlu1 %v1699_v60, 264  ;;  %1701 = vbcast.lane.b32.xlu0 %v1699_v60, 256 }
 0x27d   :  { %1713 = vbcast.lane.b32.xlu1 %v1699_v60, 280  ;;  %1709 = vbcast.lane.b32.xlu0 %v1699_v60, 272 }
 0x281   :  { %1721 = vbcast.lane.b32.xlu1 %v1699_v60, 296  ;;  %1717 = vbcast.lane.b32.xlu0 %v1699_v60, 288 }
 0x285   :  { %1729 = vbcast.lane.b32.xlu1 %v1699_v60, 312  ;;  %1725 = vbcast.lane.b32.xlu0 %v1699_v60, 304 }
 0x289   :  { %1737 = vbcast.lane.b32.xlu1 %v1699_v60, 328  ;;  %1733 = vbcast.lane.b32.xlu0 %v1699_v60, 320 }
 0x28d   :  { %1745 = vbcast.lane.b32.xlu1 %v1699_v60, 344  ;;  %1741 = vbcast.lane.b32.xlu0 %v1699_v60, 336 }
 0x291   :  { %1753 = vbcast.lane.b32.xlu1 %v1699_v60, 360  ;;  %1749 = vbcast.lane.b32.xlu0 %v1699_v60, 352 }
 0x295   :  { %1761 = vbcast.lane.b32.xlu1 %v1699_v60, 376  ;;  %1757 = vbcast.lane.b32.xlu0 %v1699_v60, 368 }
 0x299   :  { %1772 = vbcast.lane.b32.xlu1 %v1766_v3, 264  ;;  %1768 = vbcast.lane.b32.xlu0 %v1766_v3, 256 }
 0x29d   :  { %1780 = vbcast.lane.b32.xlu1 %v1766_v3, 280  ;;  %1776 = vbcast.lane.b32.xlu0 %v1766_v3, 272 }
 0x2a1   :  { %1788 = vbcast.lane.b32.xlu1 %v1766_v3, 296  ;;  %1784 = vbcast.lane.b32.xlu0 %v1766_v3, 288 }
 0x2a5   :  { %1796 = vbcast.lane.b32.xlu1 %v1766_v3, 312  ;;  %1792 = vbcast.lane.b32.xlu0 %v1766_v3, 304 }
 0x2a9   :  { %1804 = vbcast.lane.b32.xlu1 %v1766_v3, 328  ;;  %1800 = vbcast.lane.b32.xlu0 %v1766_v3, 320 }
 0x2ad   :  { %1812 = vbcast.lane.b32.xlu1 %v1766_v3, 344  ;;  %1808 = vbcast.lane.b32.xlu0 %v1766_v3, 336 }
 0x2b1   :  { %1820 = vbcast.lane.b32.xlu1 %v1766_v3, 360  ;;  %1816 = vbcast.lane.b32.xlu0 %v1766_v3, 352 }
 0x2b5   :  { %1828 = vbcast.lane.b32.xlu1 %v1766_v3, 376  ;;  %1824 = vbcast.lane.b32.xlu0 %v1766_v3, 368 }
 0x2b9   :  { %1839 = vbcast.lane.b32.xlu1 %v1833_v11, 264  ;;  %1835 = vbcast.lane.b32.xlu0 %v1833_v11, 256 }
 0x2bd   :  { %1847 = vbcast.lane.b32.xlu1 %v1833_v11, 280  ;;  %1843 = vbcast.lane.b32.xlu0 %v1833_v11, 272 }
 0x2c1   :  { %1855 = vbcast.lane.b32.xlu1 %v1833_v11, 296  ;;  %1851 = vbcast.lane.b32.xlu0 %v1833_v11, 288 }
 0x2c5   :  { %1863 = vbcast.lane.b32.xlu1 %v1833_v11, 312  ;;  %1859 = vbcast.lane.b32.xlu0 %v1833_v11, 304 }
 0x2c9   :  { %1871 = vbcast.lane.b32.xlu1 %v1833_v11, 328  ;;  %1867 = vbcast.lane.b32.xlu0 %v1833_v11, 320 }
 0x2cb   :  { %v1639_v39 = vpop.permute.xlu1 %1638  ;;  %v1635_v12 = vpop.permute.xlu0 %1634 }
 0x2cc   :  { %v1899_v30 = vmul.f32 %v2193_v44, %v1639_v39  ;;  %v1900_v26 = vmul.f32 %v2194_v5, %v1639_v39  ;;  %v1897_v40 = vmul.f32 %v2195_v38, %v1635_v12  ;;  %v1898_v19 = vmul.f32 %v2196_v17, %v1635_v12  ;;  %v2218_v39 = vld [vmem:[#allocation3 + $0xd8] sm:$0xff]  ;;  %v2219_v44 = vld [vmem:[#allocation3 + $0xc0] sm:$0xff]  ;;  %v2220_v5 = vld [vmem:[#allocation3 + $0xc8] sm:$0xff] }
 0x2cd   :  { %1879 = vbcast.lane.b32.xlu1 %v1833_v11, 344  ;;  %1875 = vbcast.lane.b32.xlu0 %v1833_v11, 336  ;;  %v2221_v17 = vld [vmem:[#allocation3 + $0xf0] sm:$0xff] }
 0x2ce   :  { %2027 = vst [vmem:[#allocation8 + $0x10] sm:$0xff] %v1899_v30  ;;  %2028 = vst [vmem:[#allocation8 + $0x18] sm:$0xff] %v1900_v26 }
 0x2cf   :  { %2025 = vst [vmem:[#allocation8] sm:$0xff] %v1897_v40  ;;  %2026 = vst [vmem:[#allocation8 + $0x8] sm:$0xff] %v1898_v19  ;;  %v1647_v8 = vpop.permute.xlu1 %1646  ;;  %v1643_v58 = vpop.permute.xlu0 %1642 }
 0x2d0   :  { %v1903_v27 = vmul.f32 %v2197_v50, %v1647_v8  ;;  %v1904_v13 = vmul.f32 %v2198_v46, %v1647_v8  ;;  %v1901_v20 = vmul.f32 %v2199_v15, %v1643_v58  ;;  %v1902_v62 = vmul.f32 %v2200_v1, %v1643_v58  ;;  %v2222_v8 = vld [vmem:[#allocation3 + $0xf8] sm:$0xff]  ;;  %v2223_v50 = vld [vmem:[#allocation3 + $0xe0] sm:$0xff]  ;;  %v2224_v46 = vld [vmem:[#allocation3 + $0xe8] sm:$0xff] }
 0x2d1   :  { %1887 = vbcast.lane.b32.xlu1 %v1833_v11, 360  ;;  %1883 = vbcast.lane.b32.xlu0 %v1833_v11, 352  ;;  %v2225_v1 = vld [vmem:[#allocation3 + $0x110] sm:$0xff] }
 0x2d2   :  { %2031 = vst [vmem:[#allocation8 + $0x30] sm:$0xff] %v1903_v27  ;;  %2032 = vst [vmem:[#allocation8 + $0x38] sm:$0xff] %v1904_v13 }
 0x2d3   :  { %2029 = vst [vmem:[#allocation8 + $0x20] sm:$0xff] %v1901_v20  ;;  %2030 = vst [vmem:[#allocation8 + $0x28] sm:$0xff] %v1902_v62  ;;  %v1655_v59 = vpop.permute.xlu1 %1654  ;;  %v1651_v4 = vpop.permute.xlu0 %1650 }
 0x2d4   :  { %v1907_v32 = vmul.f32 %v2201_v14, %v1655_v59  ;;  %v1908_v53 = vmul.f32 %v2202_v18, %v1655_v59  ;;  %v1905_v24 = vmul.f32 %v2203_v55, %v1651_v4  ;;  %v1906_v34 = vmul.f32 %v2204_v29, %v1651_v4  ;;  %v2226_v59 = vld [vmem:[#allocation3 + $0x118] sm:$0xff]  ;;  %v2227_v14 = vld [vmem:[#allocation3 + $0x100] sm:$0xff]  ;;  %v2228_v18 = vld [vmem:[#allocation3 + $0x108] sm:$0xff] }
 0x2d5   :  { %1895 = vbcast.lane.b32.xlu1 %v1833_v11, 376  ;;  %1891 = vbcast.lane.b32.xlu0 %v1833_v11, 368  ;;  %v2229_v29 = vld [vmem:[#allocation3 + $0x130] sm:$0xff] }
 0x2d6   :  { %2035 = vst [vmem:[#allocation8 + $0x50] sm:$0xff] %v1907_v32  ;;  %2036 = vst [vmem:[#allocation8 + $0x58] sm:$0xff] %v1908_v53 }
 0x2d7   :  { %2033 = vst [vmem:[#allocation8 + $0x40] sm:$0xff] %v1905_v24  ;;  %2034 = vst [vmem:[#allocation8 + $0x48] sm:$0xff] %v1906_v34  ;;  %v1663_v31 = vpop.permute.xlu1 %1662  ;;  %v1659_v54 = vpop.permute.xlu0 %1658 }
 0x2d8   :  { %v1911_v41 = vmul.f32 %v2205_v2, %v1663_v31  ;;  %v1912_v52 = vmul.f32 %v2206_v9, %v1663_v31  ;;  %v1909_v49 = vmul.f32 %v2207_v10, %v1659_v54  ;;  %v1910_v0 = vmul.f32 %v2208_v47, %v1659_v54  ;;  %v2230_v31 = vld [vmem:[#allocation3 + $0x138] sm:$0xff]  ;;  %v2231_v2 = vld [vmem:[#allocation3 + $0x120] sm:$0xff]  ;;  %v2232_v9 = vld [vmem:[#allocation3 + $0x128] sm:$0xff] }
 0x2d9   :  { %v2233_v47 = vld [vmem:[#allocation3 + $0x150] sm:$0xff] }
 0x2da   :  { %2039 = vst [vmem:[#allocation8 + $0x70] sm:$0xff] %v1911_v41  ;;  %2040 = vst [vmem:[#allocation8 + $0x78] sm:$0xff] %v1912_v52 }
 0x2db   :  { %2037 = vst [vmem:[#allocation8 + $0x60] sm:$0xff] %v1909_v49  ;;  %2038 = vst [vmem:[#allocation8 + $0x68] sm:$0xff] %v1910_v0  ;;  %v1671_v57 = vpop.permute.xlu1 %1670  ;;  %v1667_v43 = vpop.permute.xlu0 %1666 }
 0x2dc   :  { %v1915_v25 = vmul.f32 %v2209_v6, %v1671_v57  ;;  %v1916_v56 = vmul.f32 %v2210_v45, %v1671_v57  ;;  %v1913_v35 = vmul.f32 %v2211_v37, %v1667_v43  ;;  %v1914_v28 = vmul.f32 %v2212_v22, %v1667_v43  ;;  %v2234_v57 = vld [vmem:[#allocation3 + $0x158] sm:$0xff]  ;;  %v2235_v6 = vld [vmem:[#allocation3 + $0x140] sm:$0xff]  ;;  %v2236_v45 = vld [vmem:[#allocation3 + $0x148] sm:$0xff] }
 0x2dd   :  { %v2237_v22 = vld [vmem:[#allocation3 + $0x170] sm:$0xff] }
 0x2de   :  { %2043 = vst [vmem:[#allocation8 + $0x90] sm:$0xff] %v1915_v25  ;;  %2044 = vst [vmem:[#allocation8 + $0x98] sm:$0xff] %v1916_v56 }
 0x2df   :  { %2041 = vst [vmem:[#allocation8 + $0x80] sm:$0xff] %v1913_v35  ;;  %2042 = vst [vmem:[#allocation8 + $0x88] sm:$0xff] %v1914_v28  ;;  %v1679_v36 = vpop.permute.xlu1 %1678  ;;  %v1675_v51 = vpop.permute.xlu0 %1674 }
 0x2e0   :  { %v1919_v63 = vmul.f32 %v2213_v23, %v1679_v36  ;;  %v1920_v21 = vmul.f32 %v2214_v16, %v1679_v36  ;;  %v1917_v48 = vmul.f32 %v2215_v42, %v1675_v51  ;;  %v1918_v60 = vmul.f32 %v2216_v7, %v1675_v51  ;;  %v2238_v36 = vld [vmem:[#allocation3 + $0x178] sm:$0xff]  ;;  %v2239_v23 = vld [vmem:[#allocation3 + $0x160] sm:$0xff]  ;;  %v2240_v16 = vld [vmem:[#allocation3 + $0x168] sm:$0xff] }
 0x2e1   :  { %v2241_v7 = vld [vmem:[#allocation3 + $0x190] sm:$0xff] }
 0x2e2   :  { %2047 = vst [vmem:[#allocation8 + $0xb0] sm:$0xff] %v1919_v63  ;;  %2048 = vst [vmem:[#allocation8 + $0xb8] sm:$0xff] %v1920_v21 }
 0x2e3   :  { %2045 = vst [vmem:[#allocation8 + $0xa0] sm:$0xff] %v1917_v48  ;;  %2046 = vst [vmem:[#allocation8 + $0xa8] sm:$0xff] %v1918_v60  ;;  %v1687_v33 = vpop.permute.xlu1 %1686  ;;  %v1683_v3 = vpop.permute.xlu0 %1682 }
 0x2e4   :  { %v1923_v11 = vmul.f32 %v2217_v61, %v1687_v33  ;;  %v1924_v12 = vmul.f32 %v2218_v39, %v1687_v33  ;;  %v1921_v30 = vmul.f32 %v2219_v44, %v1683_v3  ;;  %v1922_v26 = vmul.f32 %v2220_v5, %v1683_v3  ;;  %v2242_v33 = vld [vmem:[#allocation3 + $0x198] sm:$0xff]  ;;  %v2243_v61 = vld [vmem:[#allocation3 + $0x180] sm:$0xff]  ;;  %v2244_v39 = vld [vmem:[#allocation3 + $0x188] sm:$0xff] }
 0x2e5   :  { %v2245_v5 = vld [vmem:[#allocation3 + $0x1b0] sm:$0xff] }
 0x2e6   :  { %2051 = vst [vmem:[#allocation8 + $0xd0] sm:$0xff] %v1923_v11  ;;  %2052 = vst [vmem:[#allocation8 + $0xd8] sm:$0xff] %v1924_v12 }
 0x2e7   :  { %2049 = vst [vmem:[#allocation8 + $0xc0] sm:$0xff] %v1921_v30  ;;  %2050 = vst [vmem:[#allocation8 + $0xc8] sm:$0xff] %v1922_v26  ;;  %v1695_v38 = vpop.permute.xlu1 %1694  ;;  %v1691_v40 = vpop.permute.xlu0 %1690 }
 0x2e8   :  { %v1927_v19 = vmul.f32 %v2221_v17, %v1695_v38  ;;  %v1928_v58 = vmul.f32 %v2222_v8, %v1695_v38  ;;  %v1925_v27 = vmul.f32 %v2223_v50, %v1691_v40  ;;  %v1926_v13 = vmul.f32 %v2224_v46, %v1691_v40  ;;  %v2246_v38 = vld [vmem:[#allocation3 + $0x1b8] sm:$0xff]  ;;  %v2247_v17 = vld [vmem:[#allocation3 + $0x1a0] sm:$0xff]  ;;  %v2248_v8 = vld [vmem:[#allocation3 + $0x1a8] sm:$0xff] }
 0x2e9   :  { %v2249_v46 = vld [vmem:[#allocation3 + $0x1d0] sm:$0xff] }
 0x2ea   :  { %2055 = vst [vmem:[#allocation8 + $0xf0] sm:$0xff] %v1927_v19  ;;  %2056 = vst [vmem:[#allocation8 + $0xf8] sm:$0xff] %v1928_v58 }
 0x2eb   :  { %2053 = vst [vmem:[#allocation8 + $0xe0] sm:$0xff] %v1925_v27  ;;  %2054 = vst [vmem:[#allocation8 + $0xe8] sm:$0xff] %v1926_v13  ;;  %v1706_v15 = vpop.permute.xlu1 %1705  ;;  %v1702_v20 = vpop.permute.xlu0 %1701 }
 0x2ec   :  { %v1931_v62 = vmul.f32 %v2225_v1, %v1706_v15  ;;  %v1932_v4 = vmul.f32 %v2226_v59, %v1706_v15  ;;  %v1929_v32 = vmul.f32 %v2227_v14, %v1702_v20  ;;  %v1930_v53 = vmul.f32 %v2228_v18, %v1702_v20  ;;  %v2250_v15 = vld [vmem:[#allocation3 + $0x1d8] sm:$0xff]  ;;  %v2251_v1 = vld [vmem:[#allocation3 + $0x1c0] sm:$0xff]  ;;  %v2252_v59 = vld [vmem:[#allocation3 + $0x1c8] sm:$0xff] }
 0x2ed   :  { %v2253_v18 = vld [vmem:[#allocation3 + $0x1f0] sm:$0xff] }
 0x2ee   :  { %2059 = vst [vmem:[#allocation8 + $0x110] sm:$0xff] %v1931_v62  ;;  %2060 = vst [vmem:[#allocation8 + $0x118] sm:$0xff] %v1932_v4 }
 0x2ef   :  { %2057 = vst [vmem:[#allocation8 + $0x100] sm:$0xff] %v1929_v32  ;;  %2058 = vst [vmem:[#allocation8 + $0x108] sm:$0xff] %v1930_v53  ;;  %v1714_v55 = vpop.permute.xlu1 %1713  ;;  %v1710_v24 = vpop.permute.xlu0 %1709 }
 0x2f0   :  { %v1935_v34 = vmul.f32 %v2229_v29, %v1714_v55  ;;  %v1936_v54 = vmul.f32 %v2230_v31, %v1714_v55  ;;  %v1933_v41 = vmul.f32 %v2231_v2, %v1710_v24  ;;  %v1934_v52 = vmul.f32 %v2232_v9, %v1710_v24  ;;  %v2254_v55 = vld [vmem:[#allocation3 + $0x1f8] sm:$0xff]  ;;  %v2255_v29 = vld [vmem:[#allocation3 + $0x1e0] sm:$0xff]  ;;  %v2256_v31 = vld [vmem:[#allocation3 + $0x1e8] sm:$0xff] }
 0x2f1   :  { %v2257_v9 = vld [vmem:[#allocation3 + $0x210] sm:$0xff] }
 0x2f2   :  { %2063 = vst [vmem:[#allocation8 + $0x130] sm:$0xff] %v1935_v34  ;;  %2064 = vst [vmem:[#allocation8 + $0x138] sm:$0xff] %v1936_v54 }
 0x2f3   :  { %2061 = vst [vmem:[#allocation8 + $0x120] sm:$0xff] %v1933_v41  ;;  %2062 = vst [vmem:[#allocation8 + $0x128] sm:$0xff] %v1934_v52  ;;  %v1722_v10 = vpop.permute.xlu1 %1721  ;;  %v1718_v49 = vpop.permute.xlu0 %1717 }
 0x2f4   :  { %v1939_v0 = vmul.f32 %v2233_v47, %v1722_v10  ;;  %v1940_v43 = vmul.f32 %v2234_v57, %v1722_v10  ;;  %v1937_v25 = vmul.f32 %v2235_v6, %v1718_v49  ;;  %v1938_v56 = vmul.f32 %v2236_v45, %v1718_v49  ;;  %v2258_v10 = vld [vmem:[#allocation3 + $0x218] sm:$0xff]  ;;  %v2259_v47 = vld [vmem:[#allocation3 + $0x200] sm:$0xff]  ;;  %v2260_v57 = vld [vmem:[#allocation3 + $0x208] sm:$0xff] }
 0x2f5   :  { %v2261_v45 = vld [vmem:[#allocation3 + $0x230] sm:$0xff] }
 0x2f6   :  { %2067 = vst [vmem:[#allocation8 + $0x150] sm:$0xff] %v1939_v0  ;;  %2068 = vst [vmem:[#allocation8 + $0x158] sm:$0xff] %v1940_v43 }
 0x2f7   :  { %2065 = vst [vmem:[#allocation8 + $0x140] sm:$0xff] %v1937_v25  ;;  %2066 = vst [vmem:[#allocation8 + $0x148] sm:$0xff] %v1938_v56  ;;  %v1730_v37 = vpop.permute.xlu1 %1729  ;;  %v1726_v35 = vpop.permute.xlu0 %1725 }
 0x2f8   :  { %v1943_v28 = vmul.f32 %v2237_v22, %v1730_v37  ;;  %v1944_v51 = vmul.f32 %v2238_v36, %v1730_v37  ;;  %v1941_v63 = vmul.f32 %v2239_v23, %v1726_v35  ;;  %v1942_v21 = vmul.f32 %v2240_v16, %v1726_v35  ;;  %v2262_v37 = vld [vmem:[#allocation3 + $0x238] sm:$0xff]  ;;  %v2263_v22 = vld [vmem:[#allocation3 + $0x220] sm:$0xff]  ;;  %v2264_v36 = vld [vmem:[#allocation3 + $0x228] sm:$0xff] }
 0x2f9   :  { %v2265_v16 = vld [vmem:[#allocation3 + $0x250] sm:$0xff] }
 0x2fa   :  { %2071 = vst [vmem:[#allocation8 + $0x170] sm:$0xff] %v1943_v28  ;;  %2072 = vst [vmem:[#allocation8 + $0x178] sm:$0xff] %v1944_v51 }
 0x2fb   :  { %2069 = vst [vmem:[#allocation8 + $0x160] sm:$0xff] %v1941_v63  ;;  %2070 = vst [vmem:[#allocation8 + $0x168] sm:$0xff] %v1942_v21  ;;  %v1738_v42 = vpop.permute.xlu1 %1737  ;;  %v1734_v48 = vpop.permute.xlu0 %1733 }
 0x2fc   :  { %v1947_v60 = vmul.f32 %v2241_v7, %v1738_v42  ;;  %v1948_v3 = vmul.f32 %v2242_v33, %v1738_v42  ;;  %v1945_v11 = vmul.f32 %v2243_v61, %v1734_v48  ;;  %v1946_v12 = vmul.f32 %v2244_v39, %v1734_v48  ;;  %v2266_v42 = vld [vmem:[#allocation3 + $0x258] sm:$0xff]  ;;  %v2267_v7 = vld [vmem:[#allocation3 + $0x240] sm:$0xff]  ;;  %v2268_v33 = vld [vmem:[#allocation3 + $0x248] sm:$0xff] }
 0x2fd   :  { %v2269_v39 = vld [vmem:[#allocation3 + $0x270] sm:$0xff] }
 0x2fe   :  { %2075 = vst [vmem:[#allocation8 + $0x190] sm:$0xff] %v1947_v60  ;;  %2076 = vst [vmem:[#allocation8 + $0x198] sm:$0xff] %v1948_v3 }
 0x2ff   :  { %2073 = vst [vmem:[#allocation8 + $0x180] sm:$0xff] %v1945_v11  ;;  %2074 = vst [vmem:[#allocation8 + $0x188] sm:$0xff] %v1946_v12  ;;  %v1746_v44 = vpop.permute.xlu1 %1745  ;;  %v1742_v30 = vpop.permute.xlu0 %1741 }
 0x300   :  { %v1951_v26 = vmul.f32 %v2245_v5, %v1746_v44  ;;  %v1952_v40 = vmul.f32 %v2246_v38, %v1746_v44  ;;  %v1949_v19 = vmul.f32 %v2247_v17, %v1742_v30  ;;  %v1950_v58 = vmul.f32 %v2248_v8, %v1742_v30  ;;  %v2270_v44 = vld [vmem:[#allocation3 + $0x278] sm:$0xff]  ;;  %v2271_v5 = vld [vmem:[#allocation3 + $0x260] sm:$0xff]  ;;  %v2272_v38 = vld [vmem:[#allocation3 + $0x268] sm:$0xff] }
 0x301   :  { %v2273_v8 = vld [vmem:[#allocation3 + $0x290] sm:$0xff] }
 0x302   :  { %2079 = vst [vmem:[#allocation8 + $0x1b0] sm:$0xff] %v1951_v26  ;;  %2080 = vst [vmem:[#allocation8 + $0x1b8] sm:$0xff] %v1952_v40 }
 0x303   :  { %2077 = vst [vmem:[#allocation8 + $0x1a0] sm:$0xff] %v1949_v19  ;;  %2078 = vst [vmem:[#allocation8 + $0x1a8] sm:$0xff] %v1950_v58  ;;  %v1754_v50 = vpop.permute.xlu1 %1753  ;;  %v1750_v27 = vpop.permute.xlu0 %1749 }
 0x304   :  { %v1955_v13 = vmul.f32 %v2249_v46, %v1754_v50  ;;  %v1956_v20 = vmul.f32 %v2250_v15, %v1754_v50  ;;  %v1953_v62 = vmul.f32 %v2251_v1, %v1750_v27  ;;  %v1954_v4 = vmul.f32 %v2252_v59, %v1750_v27  ;;  %v2274_v50 = vld [vmem:[#allocation3 + $0x298] sm:$0xff]  ;;  %v2275_v46 = vld [vmem:[#allocation3 + $0x280] sm:$0xff]  ;;  %v2276_v15 = vld [vmem:[#allocation3 + $0x288] sm:$0xff] }
 0x305   :  { %v2277_v59 = vld [vmem:[#allocation3 + $0x2b0] sm:$0xff] }
 0x306   :  { %2083 = vst [vmem:[#allocation8 + $0x1d0] sm:$0xff] %v1955_v13  ;;  %2084 = vst [vmem:[#allocation8 + $0x1d8] sm:$0xff] %v1956_v20 }
 0x307   :  { %2081 = vst [vmem:[#allocation8 + $0x1c0] sm:$0xff] %v1953_v62  ;;  %2082 = vst [vmem:[#allocation8 + $0x1c8] sm:$0xff] %v1954_v4  ;;  %v1762_v14 = vpop.permute.xlu1 %1761  ;;  %v1758_v32 = vpop.permute.xlu0 %1757 }
 0x308   :  { %v1959_v53 = vmul.f32 %v2253_v18, %v1762_v14  ;;  %v1960_v24 = vmul.f32 %v2254_v55, %v1762_v14  ;;  %v1957_v34 = vmul.f32 %v2255_v29, %v1758_v32  ;;  %v1958_v54 = vmul.f32 %v2256_v31, %v1758_v32  ;;  %v2278_v14 = vld [vmem:[#allocation3 + $0x2b8] sm:$0xff]  ;;  %v2279_v18 = vld [vmem:[#allocation3 + $0x2a0] sm:$0xff]  ;;  %v2280_v55 = vld [vmem:[#allocation3 + $0x2a8] sm:$0xff] }
 0x309   :  { %v2281_v31 = vld [vmem:[#allocation3 + $0x2d0] sm:$0xff] }
 0x30a   :  { %2087 = vst [vmem:[#allocation8 + $0x1f0] sm:$0xff] %v1959_v53  ;;  %2088 = vst [vmem:[#allocation8 + $0x1f8] sm:$0xff] %v1960_v24 }
 0x30b   :  { %2085 = vst [vmem:[#allocation8 + $0x1e0] sm:$0xff] %v1957_v34  ;;  %2086 = vst [vmem:[#allocation8 + $0x1e8] sm:$0xff] %v1958_v54  ;;  %v1773_v2 = vpop.permute.xlu1 %1772  ;;  %v1769_v41 = vpop.permute.xlu0 %1768 }
 0x30c   :  { %v1963_v52 = vmul.f32 %v2257_v9, %v1773_v2  ;;  %v1964_v49 = vmul.f32 %v2258_v10, %v1773_v2  ;;  %v1961_v0 = vmul.f32 %v2259_v47, %v1769_v41  ;;  %v1962_v43 = vmul.f32 %v2260_v57, %v1769_v41  ;;  %v2282_v2 = vld [vmem:[#allocation3 + $0x2d8] sm:$0xff]  ;;  %v2283_v9 = vld [vmem:[#allocation3 + $0x2c0] sm:$0xff]  ;;  %v2284_v10 = vld [vmem:[#allocation3 + $0x2c8] sm:$0xff] }
 0x30d   :  { %v2285_v57 = vld [vmem:[#allocation3 + $0x2f0] sm:$0xff] }
 0x30e   :  { %2091 = vst [vmem:[#allocation8 + $0x210] sm:$0xff] %v1963_v52  ;;  %2092 = vst [vmem:[#allocation8 + $0x218] sm:$0xff] %v1964_v49 }
 0x30f   :  { %2089 = vst [vmem:[#allocation8 + $0x200] sm:$0xff] %v1961_v0  ;;  %2090 = vst [vmem:[#allocation8 + $0x208] sm:$0xff] %v1962_v43  ;;  %v1781_v6 = vpop.permute.xlu1 %1780  ;;  %v1777_v25 = vpop.permute.xlu0 %1776 }
 0x310   :  { %v1967_v56 = vmul.f32 %v2261_v45, %v1781_v6  ;;  %v1968_v35 = vmul.f32 %v2262_v37, %v1781_v6  ;;  %v1965_v28 = vmul.f32 %v2263_v22, %v1777_v25  ;;  %v1966_v51 = vmul.f32 %v2264_v36, %v1777_v25  ;;  %v2286_v6 = vld [vmem:[#allocation3 + $0x2f8] sm:$0xff]  ;;  %v2287_v45 = vld [vmem:[#allocation3 + $0x2e0] sm:$0xff]  ;;  %v2288_v37 = vld [vmem:[#allocation3 + $0x2e8] sm:$0xff] }
 0x311   :  { %v2289_v36 = vld [vmem:[#allocation3 + $0x310] sm:$0xff] }
 0x312   :  { %2095 = vst [vmem:[#allocation8 + $0x230] sm:$0xff] %v1967_v56  ;;  %2096 = vst [vmem:[#allocation8 + $0x238] sm:$0xff] %v1968_v35 }
 0x313   :  { %2093 = vst [vmem:[#allocation8 + $0x220] sm:$0xff] %v1965_v28  ;;  %2094 = vst [vmem:[#allocation8 + $0x228] sm:$0xff] %v1966_v51  ;;  %v1789_v23 = vpop.permute.xlu1 %1788  ;;  %v1785_v63 = vpop.permute.xlu0 %1784 }
 0x314   :  { %v1971_v21 = vmul.f32 %v2265_v16, %v1789_v23  ;;  %v1972_v48 = vmul.f32 %v2266_v42, %v1789_v23  ;;  %v1969_v60 = vmul.f32 %v2267_v7, %v1785_v63  ;;  %v1970_v3 = vmul.f32 %v2268_v33, %v1785_v63  ;;  %v2290_v23 = vld [vmem:[#allocation3 + $0x318] sm:$0xff]  ;;  %v2291_v16 = vld [vmem:[#allocation3 + $0x300] sm:$0xff]  ;;  %v2292_v42 = vld [vmem:[#allocation3 + $0x308] sm:$0xff] }
 0x315   :  { %v2293_v33 = vld [vmem:[#allocation3 + $0x330] sm:$0xff] }
 0x316   :  { %2099 = vst [vmem:[#allocation8 + $0x250] sm:$0xff] %v1971_v21  ;;  %2100 = vst [vmem:[#allocation8 + $0x258] sm:$0xff] %v1972_v48 }
 0x317   :  { %2097 = vst [vmem:[#allocation8 + $0x240] sm:$0xff] %v1969_v60  ;;  %2098 = vst [vmem:[#allocation8 + $0x248] sm:$0xff] %v1970_v3  ;;  %v1797_v61 = vpop.permute.xlu1 %1796  ;;  %v1793_v11 = vpop.permute.xlu0 %1792 }
 0x318   :  { %v1975_v12 = vmul.f32 %v2269_v39, %v1797_v61  ;;  %v1976_v30 = vmul.f32 %v2270_v44, %v1797_v61  ;;  %v1973_v26 = vmul.f32 %v2271_v5, %v1793_v11  ;;  %v1974_v40 = vmul.f32 %v2272_v38, %v1793_v11  ;;  %v2294_v61 = vld [vmem:[#allocation3 + $0x338] sm:$0xff]  ;;  %v2295_v39 = vld [vmem:[#allocation3 + $0x320] sm:$0xff]  ;;  %v2296_v44 = vld [vmem:[#allocation3 + $0x328] sm:$0xff] }
 0x319   :  { %v2297_v38 = vld [vmem:[#allocation3 + $0x350] sm:$0xff] }
 0x31a   :  { %2103 = vst [vmem:[#allocation8 + $0x270] sm:$0xff] %v1975_v12  ;;  %2104 = vst [vmem:[#allocation8 + $0x278] sm:$0xff] %v1976_v30 }
 0x31b   :  { %2101 = vst [vmem:[#allocation8 + $0x260] sm:$0xff] %v1973_v26  ;;  %2102 = vst [vmem:[#allocation8 + $0x268] sm:$0xff] %v1974_v40  ;;  %v1805_v17 = vpop.permute.xlu1 %1804  ;;  %v1801_v19 = vpop.permute.xlu0 %1800 }
 0x31c   :  { %v1979_v58 = vmul.f32 %v2273_v8, %v1805_v17  ;;  %v1980_v27 = vmul.f32 %v2274_v50, %v1805_v17  ;;  %v1977_v13 = vmul.f32 %v2275_v46, %v1801_v19  ;;  %v1978_v20 = vmul.f32 %v2276_v15, %v1801_v19  ;;  %v2298_v17 = vld [vmem:[#allocation3 + $0x358] sm:$0xff]  ;;  %v2299_v8 = vld [vmem:[#allocation3 + $0x340] sm:$0xff]  ;;  %v2300_v50 = vld [vmem:[#allocation3 + $0x348] sm:$0xff] }
 0x31d   :  { %v2301_v15 = vld [vmem:[#allocation3 + $0x370] sm:$0xff] }
 0x31e   :  { %2107 = vst [vmem:[#allocation8 + $0x290] sm:$0xff] %v1979_v58  ;;  %2108 = vst [vmem:[#allocation8 + $0x298] sm:$0xff] %v1980_v27 }
 0x31f   :  { %2105 = vst [vmem:[#allocation8 + $0x280] sm:$0xff] %v1977_v13  ;;  %2106 = vst [vmem:[#allocation8 + $0x288] sm:$0xff] %v1978_v20  ;;  %v1813_v1 = vpop.permute.xlu1 %1812  ;;  %v1809_v62 = vpop.permute.xlu0 %1808 }
 0x320   :  { %v1983_v4 = vmul.f32 %v2277_v59, %v1813_v1  ;;  %v1984_v32 = vmul.f32 %v2278_v14, %v1813_v1  ;;  %v1981_v53 = vmul.f32 %v2279_v18, %v1809_v62  ;;  %v1982_v24 = vmul.f32 %v2280_v55, %v1809_v62  ;;  %v2302_v1 = vld [vmem:[#allocation3 + $0x378] sm:$0xff]  ;;  %v2303_v59 = vld [vmem:[#allocation3 + $0x360] sm:$0xff]  ;;  %v2304_v14 = vld [vmem:[#allocation3 + $0x368] sm:$0xff] }
 0x321   :  { %v2305_v55 = vld [vmem:[#allocation3 + $0x390] sm:$0xff] }
 0x322   :  { %2111 = vst [vmem:[#allocation8 + $0x2b0] sm:$0xff] %v1983_v4  ;;  %2112 = vst [vmem:[#allocation8 + $0x2b8] sm:$0xff] %v1984_v32 }
 0x323   :  { %2109 = vst [vmem:[#allocation8 + $0x2a0] sm:$0xff] %v1981_v53  ;;  %2110 = vst [vmem:[#allocation8 + $0x2a8] sm:$0xff] %v1982_v24  ;;  %v1821_v29 = vpop.permute.xlu1 %1820  ;;  %v1817_v34 = vpop.permute.xlu0 %1816 }
 0x324   :  { %v1987_v54 = vmul.f32 %v2281_v31, %v1821_v29  ;;  %v1988_v41 = vmul.f32 %v2282_v2, %v1821_v29  ;;  %v1985_v52 = vmul.f32 %v2283_v9, %v1817_v34  ;;  %v1986_v49 = vmul.f32 %v2284_v10, %v1817_v34  ;;  %v2306_v29 = vld [vmem:[#allocation3 + $0x398] sm:$0xff]  ;;  %v2307_v31 = vld [vmem:[#allocation3 + $0x380] sm:$0xff]  ;;  %v2308_v2 = vld [vmem:[#allocation3 + $0x388] sm:$0xff] }
 0x325   :  { %v2309_v10 = vld [vmem:[#allocation3 + $0x3b0] sm:$0xff] }
 0x326   :  { %2115 = vst [vmem:[#allocation8 + $0x2d0] sm:$0xff] %v1987_v54  ;;  %2116 = vst [vmem:[#allocation8 + $0x2d8] sm:$0xff] %v1988_v41 }
 0x327   :  { %2113 = vst [vmem:[#allocation8 + $0x2c0] sm:$0xff] %v1985_v52  ;;  %2114 = vst [vmem:[#allocation8 + $0x2c8] sm:$0xff] %v1986_v49  ;;  %v1829_v47 = vpop.permute.xlu1 %1828  ;;  %v1825_v0 = vpop.permute.xlu0 %1824 }
 0x328   :  { %v1991_v43 = vmul.f32 %v2285_v57, %v1829_v47  ;;  %v1992_v25 = vmul.f32 %v2286_v6, %v1829_v47  ;;  %v1989_v56 = vmul.f32 %v2287_v45, %v1825_v0  ;;  %v1990_v35 = vmul.f32 %v2288_v37, %v1825_v0  ;;  %v2310_v47 = vld [vmem:[#allocation3 + $0x3b8] sm:$0xff]  ;;  %v2311_v57 = vld [vmem:[#allocation3 + $0x3a0] sm:$0xff]  ;;  %v2312_v6 = vld [vmem:[#allocation3 + $0x3a8] sm:$0xff] }
 0x329   :  { %v2313_v37 = vld [vmem:[#allocation3 + $0x3d0] sm:$0xff] }
 0x32a   :  { %2119 = vst [vmem:[#allocation8 + $0x2f0] sm:$0xff] %v1991_v43  ;;  %2120 = vst [vmem:[#allocation8 + $0x2f8] sm:$0xff] %v1992_v25 }
 0x32b   :  { %2117 = vst [vmem:[#allocation8 + $0x2e0] sm:$0xff] %v1989_v56  ;;  %2118 = vst [vmem:[#allocation8 + $0x2e8] sm:$0xff] %v1990_v35  ;;  %v1840_v22 = vpop.permute.xlu1 %1839  ;;  %v1836_v28 = vpop.permute.xlu0 %1835 }
 0x32c   :  { %v1995_v51 = vmul.f32 %v2289_v36, %v1840_v22  ;;  %v1996_v63 = vmul.f32 %v2290_v23, %v1840_v22  ;;  %v1993_v21 = vmul.f32 %v2291_v16, %v1836_v28  ;;  %v1994_v48 = vmul.f32 %v2292_v42, %v1836_v28  ;;  %v2314_v22 = vld [vmem:[#allocation3 + $0x3d8] sm:$0xff]  ;;  %v2315_v36 = vld [vmem:[#allocation3 + $0x3c0] sm:$0xff]  ;;  %v2316_v23 = vld [vmem:[#allocation3 + $0x3c8] sm:$0xff] }
 0x32d   :  { %v2317_v42 = vld [vmem:[#allocation3 + $0x3f0] sm:$0xff] }
 0x32e   :  { %2123 = vst [vmem:[#allocation8 + $0x310] sm:$0xff] %v1995_v51  ;;  %2124 = vst [vmem:[#allocation8 + $0x318] sm:$0xff] %v1996_v63 }
 0x32f   :  { %2121 = vst [vmem:[#allocation8 + $0x300] sm:$0xff] %v1993_v21  ;;  %2122 = vst [vmem:[#allocation8 + $0x308] sm:$0xff] %v1994_v48  ;;  %v1848_v7 = vpop.permute.xlu1 %1847  ;;  %v1844_v60 = vpop.permute.xlu0 %1843 }
 0x330   :  { %v1999_v3 = vmul.f32 %v2293_v33, %v1848_v7  ;;  %v2000_v11 = vmul.f32 %v2294_v61, %v1848_v7  ;;  %v1997_v12 = vmul.f32 %v2295_v39, %v1844_v60  ;;  %v1998_v30 = vmul.f32 %v2296_v44, %v1844_v60  ;;  %v2318_v7 = vld [vmem:[#allocation3 + $0x3f8] sm:$0xff]  ;;  %v2319_v33 = vld [vmem:[#allocation3 + $0x3e0] sm:$0xff]  ;;  %v2320_v61 = vld [vmem:[#allocation3 + $0x3e8] sm:$0xff] }
 0x332   :  { %2127 = vst [vmem:[#allocation8 + $0x330] sm:$0xff] %v1999_v3  ;;  %2128 = vst [vmem:[#allocation8 + $0x338] sm:$0xff] %v2000_v11 }
 0x333   :  { %2125 = vst [vmem:[#allocation8 + $0x320] sm:$0xff] %v1997_v12  ;;  %2126 = vst [vmem:[#allocation8 + $0x328] sm:$0xff] %v1998_v30  ;;  %v1856_v5 = vpop.permute.xlu1 %1855  ;;  %v1852_v26 = vpop.permute.xlu0 %1851 }
 0x334   :  { %v2003_v40 = vmul.f32 %v2297_v38, %v1856_v5  ;;  %v2004_v19 = vmul.f32 %v2298_v17, %v1856_v5  ;;  %v2001_v58 = vmul.f32 %v2299_v8, %v1852_v26  ;;  %v2002_v27 = vmul.f32 %v2300_v50, %v1852_v26 }
 0x336   :  { %2131 = vst [vmem:[#allocation8 + $0x350] sm:$0xff] %v2003_v40  ;;  %2132 = vst [vmem:[#allocation8 + $0x358] sm:$0xff] %v2004_v19 }
 0x337   :  { %2129 = vst [vmem:[#allocation8 + $0x340] sm:$0xff] %v2001_v58  ;;  %2130 = vst [vmem:[#allocation8 + $0x348] sm:$0xff] %v2002_v27  ;;  %v1864_v46 = vpop.permute.xlu1 %1863  ;;  %v1860_v13 = vpop.permute.xlu0 %1859 }
 0x338   :  { %v2007_v20 = vmul.f32 %v2301_v15, %v1864_v46  ;;  %v2008_v62 = vmul.f32 %v2302_v1, %v1864_v46  ;;  %v2005_v4 = vmul.f32 %v2303_v59, %v1860_v13  ;;  %v2006_v32 = vmul.f32 %v2304_v14, %v1860_v13 }
 0x33a   :  { %2135 = vst [vmem:[#allocation8 + $0x370] sm:$0xff] %v2007_v20  ;;  %2136 = vst [vmem:[#allocation8 + $0x378] sm:$0xff] %v2008_v62 }
 0x33b   :  { %2133 = vst [vmem:[#allocation8 + $0x360] sm:$0xff] %v2005_v4  ;;  %2134 = vst [vmem:[#allocation8 + $0x368] sm:$0xff] %v2006_v32  ;;  %v1872_v18 = vpop.permute.xlu1 %1871  ;;  %v1868_v53 = vpop.permute.xlu0 %1867 }
 0x33c   :  { %v2011_v24 = vmul.f32 %v2305_v55, %v1872_v18  ;;  %v2012_v34 = vmul.f32 %v2306_v29, %v1872_v18  ;;  %v2009_v54 = vmul.f32 %v2307_v31, %v1868_v53  ;;  %v2010_v41 = vmul.f32 %v2308_v2, %v1868_v53 }
 0x33e   :  { %2139 = vst [vmem:[#allocation8 + $0x390] sm:$0xff] %v2011_v24  ;;  %2140 = vst [vmem:[#allocation8 + $0x398] sm:$0xff] %v2012_v34 }
 0x33f   :  { %2137 = vst [vmem:[#allocation8 + $0x380] sm:$0xff] %v2009_v54  ;;  %2138 = vst [vmem:[#allocation8 + $0x388] sm:$0xff] %v2010_v41  ;;  %v1880_v9 = vpop.permute.xlu1 %1879  ;;  %v1876_v52 = vpop.permute.xlu0 %1875 }
 0x340   :  { %v2015_v49 = vmul.f32 %v2309_v10, %v1880_v9  ;;  %v2016_v0 = vmul.f32 %v2310_v47, %v1880_v9  ;;  %v2013_v43 = vmul.f32 %v2311_v57, %v1876_v52  ;;  %v2014_v25 = vmul.f32 %v2312_v6, %v1876_v52 }
 0x342   :  { %2143 = vst [vmem:[#allocation8 + $0x3b0] sm:$0xff] %v2015_v49  ;;  %2144 = vst [vmem:[#allocation8 + $0x3b8] sm:$0xff] %v2016_v0 }
 0x343   :  { %2141 = vst [vmem:[#allocation8 + $0x3a0] sm:$0xff] %v2013_v43  ;;  %2142 = vst [vmem:[#allocation8 + $0x3a8] sm:$0xff] %v2014_v25  ;;  %v1888_v45 = vpop.permute.xlu1 %1887  ;;  %v1884_v56 = vpop.permute.xlu0 %1883 }
 0x344   :  { %v2019_v35 = vmul.f32 %v2313_v37, %v1888_v45  ;;  %v2020_v28 = vmul.f32 %v2314_v22, %v1888_v45  ;;  %v2017_v51 = vmul.f32 %v2315_v36, %v1884_v56  ;;  %v2018_v63 = vmul.f32 %v2316_v23, %v1884_v56 }
 0x346   :  { %2147 = vst [vmem:[#allocation8 + $0x3d0] sm:$0xff] %v2019_v35  ;;  %2148 = vst [vmem:[#allocation8 + $0x3d8] sm:$0xff] %v2020_v28 }
 0x347   :  { %2145 = vst [vmem:[#allocation8 + $0x3c0] sm:$0xff] %v2017_v51  ;;  %2146 = vst [vmem:[#allocation8 + $0x3c8] sm:$0xff] %v2018_v63  ;;  %v1896_v16 = vpop.permute.xlu1 %1895  ;;  %v1892_v21 = vpop.permute.xlu0 %1891 }
 0x348   :  { %v2023_v48 = vmul.f32 %v2317_v42, %v1896_v16  ;;  %v2024_v60 = vmul.f32 %v2318_v7, %v1896_v16  ;;  %v2021_v3 = vmul.f32 %v2319_v33, %v1892_v21  ;;  %v2022_v11 = vmul.f32 %v2320_v61, %v1892_v21 }
 0x34a   :  { %2151 = vst [vmem:[#allocation8 + $0x3f0] sm:$0xff] %v2023_v48  ;;  %2152 = vst [vmem:[#allocation8 + $0x3f8] sm:$0xff] %v2024_v60 }
 0x34b   :  { %2149 = vst [vmem:[#allocation8 + $0x3e0] sm:$0xff] %v2021_v3  ;;  %2150 = vst [vmem:[#allocation8 + $0x3e8] sm:$0xff] %v2022_v11 }
 0x34c   :  { %2366 = shalt.err (!%p2363_p3)
}
 0x34d   :  { %s2367_s22 = scalar_lea.hbm %s3726_s3, 16384 }
 0x34e   :  { %p2368_p4 = scmp.ne.s32.totalorder %s3726_s3, %s2367_s22  ;;  %p2371_p5 = scmp.lt.u32.totalorder %s2367_s22, %s3726_s3 }
 0x350   :  { %p2373_p6 = pnand %p2371_p5, %p2368_p4 }
 0x352   :  { %2376 = shalt.err (!%p2373_p6)
}
 0x353   :  { %2164 = dma.vmem_to_hbm [thread:$0]  %s2159_s18, 16384, %s3726_s3, [#allocation5], %s2384_s1, %s2384_s1, %s2385_s25  }
 0x354   :  { %2381 = dma.done.wait [#allocation5], 16384  }
 0x355   :  { %2382 = vsyncadd [#allocation5], 4294950912 }
 0x356   :  { %2168 = vsyncpa [#allocation4], 1 }
 0x357   :  { %2169 = vsyncpa [#allocation5], 1 }
 0x358   :  { %2170 = vsyncpa [#allocation6], 1 }

</bundles_post_ra>
